<compile_context>
chip_gen: v7x
topology: tpu7x:2x2x1
jax: 0.10.0
libtpu: 0.0.40
codegen_flags: <defaults>
</compile_context>

<pallas_src>
import numpy as np
import jax
import jax.numpy as jnp
from jax.experimental import pallas as pl
from jax.experimental.pallas import tpu as pltpu

EPS = 1e-5


def _convt_matrix(w, l_in, stride, padding, out_channel_major=False):
    """Dense T with flatten_Lmajor(x) @ T == flatten(convT1d(x)).

    Only used for the FINAL ConvT (so it can be folded with the Linear offline);
    all other ConvT layers use the sparse 4-tap lowering.
    """
    c_in, c_out, k = w.shape
    l_out = (l_in - 1) * stride - 2 * padding + k
    t = np.zeros((l_in, c_in, l_out, c_out), dtype=np.float32)
    for li in range(l_in):
        for kk in range(k):
            lo = li * stride - padding + kk
            if 0 <= lo < l_out:
                t[li, :, lo, :] += w[:, :, kk]
    if out_channel_major:
        t = t.transpose(0, 1, 3, 2)                 # (l_in, c_in, c_out, l_out)
    return t.reshape(l_in * c_in, l_out * c_out), l_out


def _make_kernel(batch, chans):
    f32 = jnp.float32
    bf16 = jnp.bfloat16
    c1, c2, c3, c4 = chans[1], chans[2], chans[3], chans[4]

    def mm(a, b):
        # bf16 operands on the MXU, f32 accumulation (astype is a no-op when the
        # activation is already bf16 from the previous bn_relu epilogue).
        return jnp.dot(a.astype(bf16), b, preferred_element_type=f32)

    def bn_relu(h, gb_ref):
        """BatchNorm1d (training-mode, full-batch stats) + ReLU.

        h: (L*B, C) f32, channels on lanes -> per-channel stats are one sublane
        reduction, scale/shift a per-lane broadcast.  Two-pass variance.  Output
        cast to bf16 exactly once here (every downstream MXU operand is bf16).
        """
        gb = gb_ref[...]                                         # (2, C) f32
        inv = 1.0 / h.shape[0]
        mean = jnp.sum(h, axis=0, keepdims=True) * inv           # (1, C)
        d = h - mean
        var = jnp.maximum(jnp.sum(d * d, axis=0, keepdims=True) * inv, 0.0)
        scale = gb[0:1, :] * jax.lax.rsqrt(var + EPS)            # (1, C)
        h = jnp.maximum(d * scale + gb[1:2, :], 0.0)
        return h.astype(bf16)

    def convt_s2(h, w_ref, l_in, c_out):
        """ConvTranspose1d(k=4, s=2, p=1, bias=False) on a length-major activation.

        h: (l_in*B, C_in) with rows r = l*B + b.  One matmul computes all four
        channel taps (flop-optimal: B*L*4*C_in*C_out); the stride-2 scatter is two
        zero-padded row-block shifts plus a block interleave (row concat), with no
        dense (L*C, L*C) matrix and no batch-boundary masking needed.
        """
        y = mm(h, w_ref[...])                                    # (l_in*B, 4*C_out)
        y0 = y[:, 0 * c_out:1 * c_out]
        y1 = y[:, 1 * c_out:2 * c_out]
        y2 = y[:, 2 * c_out:3 * c_out]
        y3 = y[:, 3 * c_out:4 * c_out]
        zblk = jnp.zeros((batch, c_out), f32)
        y3s = jnp.concatenate([zblk, y3[:-batch, :]], axis=0)    # tap3 of position l-1
        y0s = jnp.concatenate([y0[batch:, :], zblk], axis=0)     # tap0 of position l+1
        even = y1 + y3s                                          # output position 2l
        odd = y2 + y0s                                           # output position 2l+1
        blocks = []
        for m in range(l_in):
            blocks.append(even[m * batch:(m + 1) * batch, :])
            blocks.append(odd[m * batch:(m + 1) * batch, :])
        return jnp.concatenate(blocks, axis=0)                   # (2*l_in*B, C_out)

    def kernel(xn_ref, lab_ref,
               ew1_ref, eb1_ref, ew2_ref, eb2_ref,
               t1n_ref, t1e_ref, gb1_ref,
               w2_ref, gb2_ref, w3_ref, gb3_ref, w4_ref, gb4_ref,
               m5_ref, loff_ref,
               out_ref, hflat_ref):
        # ---- embed: Linear -> InstanceNorm1d(row-wise, no affine) -> LeakyReLU(0.2)
        #      -> Linear
        h = mm(lab_ref[...], ew1_ref[...]) + eb1_ref[...]
        mu = jnp.mean(h, axis=1, keepdims=True)
        d = h - mu
        var = jnp.maximum(jnp.mean(d * d, axis=1, keepdims=True), 0.0)
        h = d * jax.lax.rsqrt(var + EPS)
        h = jnp.where(h > 0, h, 0.2 * h)
        emb = mm(h, ew2_ref[...]) + eb2_ref[...]                 # (B, emb_dim) f32

        # ---- gen block 1: ConvT(k4,s1,p0) from L_in=1 (genuinely dense); the tap
        #      matrix rows are split into noise / embedding parts so the PyTorch
        #      channel concat never materializes.  Output re-laid length-major.
        y = mm(xn_ref[...], t1n_ref[...]) + mm(emb, t1e_ref[...])        # (B, 4*C1)
        h = jnp.concatenate([y[:, lo * c1:(lo + 1) * c1] for lo in range(4)], axis=0)
        h = bn_relu(h, gb1_ref)                                  # (4B, C1) bf16

        # ---- gen blocks 2-4: sparse 4-tap ConvT + BN(train stats) + ReLU
        h = bn_relu(convt_s2(h, w2_ref, 4, c2), gb2_ref)         # (8B,  C2)
        h = bn_relu(convt_s2(h, w3_ref, 8, c3), gb3_ref)         # (16B, C3)
        h = bn_relu(convt_s2(h, w4_ref, 16, c4), gb4_ref)        # (32B, C4)

        # ---- tail: final ConvT (+bias) and Linear(64, seq_len) folded offline into
        #      one lane-dense matmul M5.  Repack (32B, C4) length-major rows into a
        #      (B, 32*C4) L-major operand through VMEM scratch (static ref stores,
        #      no in-register reshape), then one MXU push + Hardtanh + full-width
        #      (lane-dense) store of the padded output slab.
        for l in range(32):
            hflat_ref[:, l * c4:(l + 1) * c4] = h[l * batch:(l + 1) * batch, :]
        out_ref[...] = jnp.clip(mm(hflat_ref[...], m5_ref[...]) + loff_ref[...],
                                -1.0, 1.0)

    return kernel


def init_params(key, noise_dim, ngf, cond_dim, seq_len, seq_ch, emb_dim):
    ks = jax.random.split(key, 20)
    f32 = jnp.float32

    def lin(k, fan_in, fan_out):          # stored already transposed vs torch
        return jax.random.normal(k, (fan_in, fan_out), f32) / np.sqrt(fan_in)

    def convt(k, c_in, c_out, ksz):
        return jax.random.normal(k, (c_in, c_out, ksz), f32) / np.sqrt(c_in * ksz)

    e8 = emb_dim * 8
    c0 = noise_dim + emb_dim
    chans = [c0, ngf * 16, ngf * 8, ngf * 4, ngf * 2, seq_ch]
    return {
        'ew1': lin(ks[0], cond_dim, e8),
        'eb1': jax.random.normal(ks[1], (1, e8), f32) * 0.1,
        'ew2': lin(ks[2], e8, emb_dim),
        'eb2': jax.random.normal(ks[3], (1, emb_dim), f32) * 0.1,
        'w_convt': [convt(ks[4 + i], chans[i], chans[i + 1], 4) for i in range(5)],
        'bias5': jax.random.normal(ks[9], (seq_ch,), f32) * 0.1,
        'bn_gamma': [1.0 + 0.1 * jax.random.normal(ks[10 + i], (chans[i + 1],), f32)
                     for i in range(4)],
        'bn_beta': [0.1 * jax.random.normal(ks[14 + i], (chans[i + 1],), f32)
                    for i in range(4)],
        'w_lin': lin(ks[18], 64, seq_len),   # nn.Linear(64, seq_len, bias=False)
    }


def build_operands(params, noise_dim, seq_len, seq_ch):
    """Lower PyTorch parameters to MXU-friendly operands.

    ConvT layers 1-4 become per-layer tap matrices (C_in, 4*C_out) (tap-major
    columns).  The final ConvT (+ bias) and the Linear(64, seq_len) are folded
    offline (f32) into one matrix M5 with zero-padded, lane-dense columns.
    """
    bf16 = jnp.bfloat16
    w = [np.asarray(x, np.float32) for x in params['w_convt']]

    def tapcat(wi):                        # (C_in, C_out, 4) -> (C_in, 4*C_out)
        return np.transpose(wi, (0, 2, 1)).reshape(wi.shape[0], 4 * wi.shape[1])

    wcat = [tapcat(wi) for wi in w[:4]]
    t1n, t1e = wcat[0][:noise_dim], wcat[0][noise_dim:]

    # Final ConvT (L_in=32 -> L_out=64), channel-major columns, folded with w_lin.
    c4 = w[4].shape[0]
    t5, l5 = _convt_matrix(w[4], 32, 2, 1, out_channel_major=True)  # (32*C4, seq_ch*64)
    assert l5 == 64, "module hard-codes nn.Linear(64, seq_len)"
    w_lin = np.asarray(params['w_lin'], np.float32)                 # (64, seq_len)
    m5 = (t5.reshape(32 * c4, seq_ch, 64) @ w_lin).reshape(32 * c4, seq_ch * seq_len)
    # ConvT5 bias folded through the (linear) Linear: (h + b_c) @ W = h@W + b_c*colsum(W)
    lin_off = (np.asarray(params['bias5'], np.float32)[:, None]
               * w_lin.sum(axis=0)[None, :]).reshape(1, seq_ch * seq_len)

    out_cols = seq_ch * seq_len
    padded = ((out_cols + 127) // 128) * 128
    m5p = np.zeros((32 * c4, padded), np.float32)
    m5p[:, :out_cols] = m5
    loffp = np.zeros((1, padded), np.float32)
    loffp[:, :out_cols] = lin_off

    def gb(i):                             # gamma/beta stacked as one (2, C) operand
        return jnp.stack([params['bn_gamma'][i], params['bn_beta'][i]], axis=0)

    return [params['ew1'].astype(bf16), params['eb1'],
            params['ew2'].astype(bf16), params['eb2'],
            jnp.asarray(t1n, bf16), jnp.asarray(t1e, bf16), gb(0),
            jnp.asarray(wcat[1], bf16), gb(1),
            jnp.asarray(wcat[2], bf16), gb(2),
            jnp.asarray(wcat[3], bf16), gb(3),
            jnp.asarray(m5p, bf16), jnp.asarray(loffp, jnp.float32)]


def gen_forward(x, labels, operands, chans, seq_ch, seq_len):
    xn = x[:, :, 0]                        # x is (B, noise_dim, 1), like PyTorch
    batch = x.shape[0]
    c4 = chans[4]
    out_cols = seq_ch * seq_len
    padded = ((out_cols + 127) // 128) * 128

    # Generation-aware scoped-VMEM budget (v7x: 64 MiB physical, v5e/v6e: 128 MiB).
    op_bytes = sum(int(np.prod(o.shape)) * o.dtype.itemsize
                   for o in (xn, labels, *operands))
    peak_y = max(batch * l_in * 4 * c_out * 4
                 for l_in, c_out in zip((1, 4, 8, 16), chans[1:5]))
    act_bytes = 8 * peak_y + 3 * batch * 32 * c4 * 4 + 2 * batch * padded * 4
    need = op_bytes + act_bytes + (4 << 20)
    try:
        cap = int(pltpu.get_tpu_info().vmem_capacity_bytes)
    except Exception:
        cap = 64 << 20                      # conservative (v7x) if query unavailable
    vmem_limit = int(min(max(need, 16 << 20), (cap * 3) // 4))

    kernel = _make_kernel(batch, chans)
    out_flat = pl.pallas_call(
        kernel,
        out_shape=jax.ShapeDtypeStruct((batch, padded), jnp.float32),
        in_specs=[pl.BlockSpec(memory_space=pltpu.MemorySpace.VMEM)]
                 * (2 + len(operands)),
        out_specs=pl.BlockSpec(memory_space=pltpu.MemorySpace.VMEM),
        scratch_shapes=[pltpu.VMEM((batch, 32 * c4), jnp.bfloat16)],
        compiler_params=pltpu.CompilerParams(vmem_limit_bytes=vmem_limit),
    )(xn, labels, *operands)
    return out_flat[:, :out_cols].reshape(batch, seq_ch, seq_len)


# ----------------------------- pure-JAX reference -----------------------------
def _convt1d_ref(x, w, stride, padding):
    """Reference ConvTranspose1d (NCW), w: (C_in, C_out, K), no bias."""
    b, c_in, l_in = x.shape
    k = w.shape[2]
    l_out = (l_in - 1) * stride - 2 * padding + k
    out = jnp.zeros((b, w.shape[1], l_out), jnp.float32)
    for li in range(l_in):
        for kk in range(k):
            lo = li * stride - padding + kk
            if 0 <= lo < l_out:
                out = out.at[:, :, lo].add(x[:, :, li] @ w[:, :, kk])
    return out


def reference_forward(x, labels, params):
    h = labels @ params['ew1'] + params['eb1']
    mu = h.mean(axis=1, keepdims=True)
    var = ((h - mu) ** 2).mean(axis=1, keepdims=True)
    h = (h - mu) / jnp.sqrt(var + EPS)
    h = jnp.where(h > 0, h, 0.2 * h)
    emb = h @ params['ew2'] + params['eb2']
    h = jnp.concatenate([x[:, :, 0], emb], axis=1)[:, :, None]    # (B, C0, 1)
    strides, pads = [1, 2, 2, 2, 2], [0, 1, 1, 1, 1]
    for i in range(4):
        h = _convt1d_ref(h, params['w_convt'][i], strides[i], pads[i])
        m = h.mean(axis=(0, 2), keepdims=True)
        v = ((h - m) ** 2).mean(axis=(0, 2), keepdims=True)
        h = (h - m) / jnp.sqrt(v + EPS)
        h = h * params['bn_gamma'][i][None, :, None] + params['bn_beta'][i][None, :, None]
        h = jnp.maximum(h, 0.0)
    h = _convt1d_ref(h, params['w_convt'][4], strides[4], pads[4])
    h = h + params['bias5'][None, :, None]
    h = h @ params['w_lin']                                       # (B, seq_ch, seq_len)
    return jnp.clip(h, -1.0, 1.0)


if __name__ == "__main__":
    # small, forward-consistent shapes
    noise_dim, ngf, cond_dim = 8, 4, 5
    seq_len, seq_ch, emb_dim = 16, 3, 4
    batch = 2

    key = jax.random.PRNGKey(0)
    kx, kl, kp = jax.random.split(key, 3)
    x = jax.random.normal(kx, (batch, noise_dim, 1), jnp.float32)
    labels = jax.random.normal(kl, (batch, cond_dim), jnp.float32)

    params = init_params(kp, noise_dim, ngf, cond_dim, seq_len, seq_ch, emb_dim)
    operands = build_operands(params, noise_dim, seq_len, seq_ch)
    chans = (noise_dim + emb_dim, ngf * 16, ngf * 8, ngf * 4, ngf * 2, seq_ch)

    fwd = jax.jit(gen_forward, static_argnums=(3, 4, 5))
    out = fwd(x, labels, operands, chans, seq_ch, seq_len)
    out = jax.block_until_ready(out)
    assert out.shape == (batch, seq_ch, seq_len)

    ref = jax.jit(reference_forward)(x, labels, params)
    err = float(jnp.max(jnp.abs(out - ref)))
    assert err < 5e-2, f"kernel/reference mismatch: {err}"   # bf16-weight tolerance

    print("KERNEL_OK")
</pallas_src>

<mosaic_0001>
module attributes {stable_mosaic.version = 11 : i64} {
  func.func @kernel(%arg0: memref<2x8xf32, #tpu.memory_space<vmem>>, %arg1: memref<2x5xf32, #tpu.memory_space<vmem>>, %arg2: memref<5x32xbf16, #tpu.memory_space<vmem>>, %arg3: memref<1x32xf32, #tpu.memory_space<vmem>>, %arg4: memref<32x4xbf16, #tpu.memory_space<vmem>>, %arg5: memref<1x4xf32, #tpu.memory_space<vmem>>, %arg6: memref<8x256xbf16, #tpu.memory_space<vmem>>, %arg7: memref<4x256xbf16, #tpu.memory_space<vmem>>, %arg8: memref<2x64xf32, #tpu.memory_space<vmem>>, %arg9: memref<64x128xbf16, #tpu.memory_space<vmem>>, %arg10: memref<2x32xf32, #tpu.memory_space<vmem>>, %arg11: memref<32x64xbf16, #tpu.memory_space<vmem>>, %arg12: memref<2x16xf32, #tpu.memory_space<vmem>>, %arg13: memref<16x32xbf16, #tpu.memory_space<vmem>>, %arg14: memref<2x8xf32, #tpu.memory_space<vmem>>, %arg15: memref<256x128xbf16, #tpu.memory_space<vmem>>, %arg16: memref<1x128xf32, #tpu.memory_space<vmem>>, %arg17: memref<2x128xf32, #tpu.memory_space<vmem>>, %arg18: memref<2x256xbf16, #tpu.memory_space<vmem>>) attributes {dimension_semantics = [], scalar_prefetch = 0 : i64, scratch_operands = 1 : i64, tpu.core_type = #tpu.core_type<tc>} {
    %c0 = arith.constant 0 : index
    %c0_0 = arith.constant 0 : index
    %0 = vector.load %arg1[%c0, %c0_0] : memref<2x5xf32, #tpu.memory_space<vmem>>, vector<2x5xf32>
    %c0_1 = arith.constant 0 : index
    %c0_2 = arith.constant 0 : index
    %1 = vector.load %arg2[%c0_1, %c0_2] : memref<5x32xbf16, #tpu.memory_space<vmem>>, vector<5x32xbf16>
    %2 = arith.truncf %0 : vector<2x5xf32> to vector<2x5xbf16>
    %cst = arith.constant dense<0.000000e+00> : vector<2x32xf32>
    %3 = tpu.matmul %2, %1, %cst {dimension_numbers = #tpu.dot_dimension_numbers<[1], [0], [0], [1], [0, 0, 1, 1], [], []>} : vector<2x5xbf16>, vector<5x32xbf16>, vector<2x32xf32> -> vector<2x32xf32>
    %c0_3 = arith.constant 0 : index
    %c0_4 = arith.constant 0 : index
    %4 = vector.load %arg3[%c0_3, %c0_4] : memref<1x32xf32, #tpu.memory_space<vmem>>, vector<1x32xf32>
    %5 = vector.broadcast %4 : vector<1x32xf32> to vector<2x32xf32>
    %6 = arith.addf %3, %5 : vector<2x32xf32>
    %cst_5 = arith.constant dense<0.000000e+00> : vector<2xf32>
    %7 = vector.multi_reduction <add>, %6, %cst_5 [1] : vector<2x32xf32> to vector<2xf32>
    %8 = vector.shape_cast %7 : vector<2xf32> to vector<2x1xf32>
    %cst_6 = arith.constant 3.200000e+01 : f32
    %9 = vector.broadcast %cst_6 : f32 to vector<2x1xf32>
    %10 = arith.divf %8, %9 : vector<2x1xf32>
    %11 = vector.broadcast %10 : vector<2x1xf32> to vector<2x32xf32>
    %12 = arith.subf %6, %11 : vector<2x32xf32>
    %13 = arith.mulf %12, %12 : vector<2x32xf32>
    %cst_7 = arith.constant dense<0.000000e+00> : vector<2xf32>
    %14 = vector.multi_reduction <add>, %13, %cst_7 [1] : vector<2x32xf32> to vector<2xf32>
    %15 = vector.shape_cast %14 : vector<2xf32> to vector<2x1xf32>
    %cst_8 = arith.constant 3.200000e+01 : f32
    %16 = vector.broadcast %cst_8 : f32 to vector<2x1xf32>
    %17 = arith.divf %15, %16 : vector<2x1xf32>
    %cst_9 = arith.constant 0.000000e+00 : f32
    %18 = vector.broadcast %cst_9 : f32 to vector<2x1xf32>
    %19 = arith.maximumf %17, %18 : vector<2x1xf32>
    %cst_10 = arith.constant 9.99999974E-6 : f32
    %20 = vector.broadcast %cst_10 : f32 to vector<2x1xf32>
    %21 = arith.addf %19, %20 : vector<2x1xf32>
    %22 = math.rsqrt %21 : vector<2x1xf32>
    %23 = vector.broadcast %22 : vector<2x1xf32> to vector<2x32xf32>
    %24 = arith.mulf %12, %23 : vector<2x32xf32>
    %cst_11 = arith.constant 0.000000e+00 : f32
    %25 = vector.broadcast %cst_11 : f32 to vector<2x32xf32>
    %26 = arith.cmpf ogt, %24, %25 : vector<2x32xf32>
    %cst_12 = arith.constant 2.000000e-01 : f32
    %27 = vector.broadcast %cst_12 : f32 to vector<2x32xf32>
    %28 = arith.mulf %27, %24 : vector<2x32xf32>
    %29 = arith.select %26, %24, %28 : vector<2x32xi1>, vector<2x32xf32>
    %c0_13 = arith.constant 0 : index
    %c0_14 = arith.constant 0 : index
    %30 = vector.load %arg4[%c0_13, %c0_14] : memref<32x4xbf16, #tpu.memory_space<vmem>>, vector<32x4xbf16>
    %31 = arith.truncf %29 : vector<2x32xf32> to vector<2x32xbf16>
    %cst_15 = arith.constant dense<0.000000e+00> : vector<2x4xf32>
    %32 = tpu.matmul %31, %30, %cst_15 {dimension_numbers = #tpu.dot_dimension_numbers<[1], [0], [0], [1], [0, 0, 1, 1], [], []>} : vector<2x32xbf16>, vector<32x4xbf16>, vector<2x4xf32> -> vector<2x4xf32>
    %c0_16 = arith.constant 0 : index
    %c0_17 = arith.constant 0 : index
    %33 = vector.load %arg5[%c0_16, %c0_17] : memref<1x4xf32, #tpu.memory_space<vmem>>, vector<1x4xf32>
    %34 = vector.broadcast %33 : vector<1x4xf32> to vector<2x4xf32>
    %35 = arith.addf %32, %34 : vector<2x4xf32>
    %c0_18 = arith.constant 0 : index
    %c0_19 = arith.constant 0 : index
    %36 = vector.load %arg0[%c0_18, %c0_19] : memref<2x8xf32, #tpu.memory_space<vmem>>, vector<2x8xf32>
    %c0_20 = arith.constant 0 : index
    %c0_21 = arith.constant 0 : index
    %37 = vector.load %arg6[%c0_20, %c0_21] : memref<8x256xbf16, #tpu.memory_space<vmem>>, vector<8x256xbf16>
    %38 = arith.truncf %36 : vector<2x8xf32> to vector<2x8xbf16>
    %cst_22 = arith.constant dense<0.000000e+00> : vector<2x256xf32>
    %39 = tpu.matmul %38, %37, %cst_22 {dimension_numbers = #tpu.dot_dimension_numbers<[1], [0], [0], [1], [0, 0, 1, 1], [], []>} : vector<2x8xbf16>, vector<8x256xbf16>, vector<2x256xf32> -> vector<2x256xf32>
    %c0_23 = arith.constant 0 : index
    %c0_24 = arith.constant 0 : index
    %40 = vector.load %arg7[%c0_23, %c0_24] : memref<4x256xbf16, #tpu.memory_space<vmem>>, vector<4x256xbf16>
    %41 = arith.truncf %35 : vector<2x4xf32> to vector<2x4xbf16>
    %cst_25 = arith.constant dense<0.000000e+00> : vector<2x256xf32>
    %42 = tpu.matmul %41, %40, %cst_25 {dimension_numbers = #tpu.dot_dimension_numbers<[1], [0], [0], [1], [0, 0, 1, 1], [], []>} : vector<2x4xbf16>, vector<4x256xbf16>, vector<2x256xf32> -> vector<2x256xf32>
    %43 = arith.addf %39, %42 : vector<2x256xf32>
    %44 = vector.extract_strided_slice %43 {offsets = [0, 0], sizes = [2, 64], strides = [1, 1]} : vector<2x256xf32> to vector<2x64xf32>
    %45 = vector.extract_strided_slice %43 {offsets = [0, 64], sizes = [2, 64], strides = [1, 1]} : vector<2x256xf32> to vector<2x64xf32>
    %46 = vector.extract_strided_slice %43 {offsets = [0, 128], sizes = [2, 64], strides = [1, 1]} : vector<2x256xf32> to vector<2x64xf32>
    %47 = vector.extract_strided_slice %43 {offsets = [0, 192], sizes = [2, 64], strides = [1, 1]} : vector<2x256xf32> to vector<2x64xf32>
    %48 = tpu.concatenate %44, %45, %46, %47 in 0 : vector<2x64xf32>, vector<2x64xf32>, vector<2x64xf32>, vector<2x64xf32> -> vector<8x64xf32>
    %c0_26 = arith.constant 0 : index
    %c0_27 = arith.constant 0 : index
    %49 = vector.load %arg8[%c0_26, %c0_27] : memref<2x64xf32, #tpu.memory_space<vmem>>, vector<2x64xf32>
    %cst_28 = arith.constant dense<0.000000e+00> : vector<64xf32>
    %50 = vector.multi_reduction <add>, %48, %cst_28 [0] : vector<8x64xf32> to vector<64xf32>
    %51 = vector.shape_cast %50 : vector<64xf32> to vector<1x64xf32>
    %cst_29 = arith.constant 1.250000e-01 : f32
    %52 = vector.broadcast %cst_29 : f32 to vector<1x64xf32>
    %53 = arith.mulf %51, %52 : vector<1x64xf32>
    %54 = vector.broadcast %53 : vector<1x64xf32> to vector<8x64xf32>
    %55 = arith.subf %48, %54 : vector<8x64xf32>
    %56 = arith.mulf %55, %55 : vector<8x64xf32>
    %cst_30 = arith.constant dense<0.000000e+00> : vector<64xf32>
    %57 = vector.multi_reduction <add>, %56, %cst_30 [0] : vector<8x64xf32> to vector<64xf32>
    %58 = vector.shape_cast %57 : vector<64xf32> to vector<1x64xf32>
    %cst_31 = arith.constant 1.250000e-01 : f32
    %59 = vector.broadcast %cst_31 : f32 to vector<1x64xf32>
    %60 = arith.mulf %58, %59 : vector<1x64xf32>
    %cst_32 = arith.constant 0.000000e+00 : f32
    %61 = vector.broadcast %cst_32 : f32 to vector<1x64xf32>
    %62 = arith.maximumf %60, %61 : vector<1x64xf32>
    %63 = vector.extract_strided_slice %49 {offsets = [0, 0], sizes = [1, 64], strides = [1, 1]} : vector<2x64xf32> to vector<1x64xf32>
    %cst_33 = arith.constant 9.99999974E-6 : f32
    %64 = vector.broadcast %cst_33 : f32 to vector<1x64xf32>
    %65 = arith.addf %62, %64 : vector<1x64xf32>
    %66 = math.rsqrt %65 : vector<1x64xf32>
    %67 = arith.mulf %63, %66 : vector<1x64xf32>
    %68 = vector.broadcast %67 : vector<1x64xf32> to vector<8x64xf32>
    %69 = arith.mulf %55, %68 : vector<8x64xf32>
    %70 = vector.extract_strided_slice %49 {offsets = [1, 0], sizes = [1, 64], strides = [1, 1]} : vector<2x64xf32> to vector<1x64xf32>
    %71 = vector.broadcast %70 : vector<1x64xf32> to vector<8x64xf32>
    %72 = arith.addf %69, %71 : vector<8x64xf32>
    %cst_34 = arith.constant 0.000000e+00 : f32
    %73 = vector.broadcast %cst_34 : f32 to vector<8x64xf32>
    %74 = arith.maximumf %72, %73 : vector<8x64xf32>
    %75 = arith.truncf %74 : vector<8x64xf32> to vector<8x64xbf16>
    %c0_35 = arith.constant 0 : index
    %c0_36 = arith.constant 0 : index
    %76 = vector.load %arg9[%c0_35, %c0_36] : memref<64x128xbf16, #tpu.memory_space<vmem>>, vector<64x128xbf16>
    %cst_37 = arith.constant dense<0.000000e+00> : vector<8x128xf32>
    %77 = tpu.matmul %75, %76, %cst_37 {dimension_numbers = #tpu.dot_dimension_numbers<[1], [0], [0], [1], [0, 0, 1, 1], [], []>} : vector<8x64xbf16>, vector<64x128xbf16>, vector<8x128xf32> -> vector<8x128xf32>
    %78 = vector.extract_strided_slice %77 {offsets = [0, 0], sizes = [8, 32], strides = [1, 1]} : vector<8x128xf32> to vector<8x32xf32>
    %79 = vector.extract_strided_slice %77 {offsets = [0, 32], sizes = [8, 32], strides = [1, 1]} : vector<8x128xf32> to vector<8x32xf32>
    %80 = vector.extract_strided_slice %77 {offsets = [0, 64], sizes = [8, 32], strides = [1, 1]} : vector<8x128xf32> to vector<8x32xf32>
    %81 = vector.extract_strided_slice %77 {offsets = [0, 96], sizes = [8, 32], strides = [1, 1]} : vector<8x128xf32> to vector<8x32xf32>
    %cst_38 = arith.constant 0.000000e+00 : f32
    %82 = vector.broadcast %cst_38 : f32 to vector<2x32xf32>
    %83 = vector.extract_strided_slice %81 {offsets = [0, 0], sizes = [6, 32], strides = [1, 1]} : vector<8x32xf32> to vector<6x32xf32>
    %84 = tpu.concatenate %82, %83 in 0 : vector<2x32xf32>, vector<6x32xf32> -> vector<8x32xf32>
    %85 = vector.extract_strided_slice %78 {offsets = [2, 0], sizes = [6, 32], strides = [1, 1]} : vector<8x32xf32> to vector<6x32xf32>
    %86 = tpu.concatenate %85, %82 in 0 : vector<6x32xf32>, vector<2x32xf32> -> vector<8x32xf32>
    %87 = arith.addf %79, %84 : vector<8x32xf32>
    %88 = arith.addf %80, %86 : vector<8x32xf32>
    %89 = vector.extract_strided_slice %87 {offsets = [0, 0], sizes = [2, 32], strides = [1, 1]} : vector<8x32xf32> to vector<2x32xf32>
    %90 = vector.extract_strided_slice %88 {offsets = [0, 0], sizes = [2, 32], strides = [1, 1]} : vector<8x32xf32> to vector<2x32xf32>
    %91 = vector.extract_strided_slice %87 {offsets = [2, 0], sizes = [2, 32], strides = [1, 1]} : vector<8x32xf32> to vector<2x32xf32>
    %92 = vector.extract_strided_slice %88 {offsets = [2, 0], sizes = [2, 32], strides = [1, 1]} : vector<8x32xf32> to vector<2x32xf32>
    %93 = vector.extract_strided_slice %87 {offsets = [4, 0], sizes = [2, 32], strides = [1, 1]} : vector<8x32xf32> to vector<2x32xf32>
    %94 = vector.extract_strided_slice %88 {offsets = [4, 0], sizes = [2, 32], strides = [1, 1]} : vector<8x32xf32> to vector<2x32xf32>
    %95 = vector.extract_strided_slice %87 {offsets = [6, 0], sizes = [2, 32], strides = [1, 1]} : vector<8x32xf32> to vector<2x32xf32>
    %96 = vector.extract_strided_slice %88 {offsets = [6, 0], sizes = [2, 32], strides = [1, 1]} : vector<8x32xf32> to vector<2x32xf32>
    %97 = tpu.concatenate %89, %90, %91, %92, %93, %94, %95, %96 in 0 : vector<2x32xf32>, vector<2x32xf32>, vector<2x32xf32>, vector<2x32xf32>, vector<2x32xf32>, vector<2x32xf32>, vector<2x32xf32>, vector<2x32xf32> -> vector<16x32xf32>
    %c0_39 = arith.constant 0 : index
    %c0_40 = arith.constant 0 : index
    %98 = vector.load %arg10[%c0_39, %c0_40] : memref<2x32xf32, #tpu.memory_space<vmem>>, vector<2x32xf32>
    %cst_41 = arith.constant dense<0.000000e+00> : vector<32xf32>
    %99 = vector.multi_reduction <add>, %97, %cst_41 [0] : vector<16x32xf32> to vector<32xf32>
    %100 = vector.shape_cast %99 : vector<32xf32> to vector<1x32xf32>
    %cst_42 = arith.constant 6.250000e-02 : f32
    %101 = vector.broadcast %cst_42 : f32 to vector<1x32xf32>
    %102 = arith.mulf %100, %101 : vector<1x32xf32>
    %103 = vector.broadcast %102 : vector<1x32xf32> to vector<16x32xf32>
    %104 = arith.subf %97, %103 : vector<16x32xf32>
    %105 = arith.mulf %104, %104 : vector<16x32xf32>
    %cst_43 = arith.constant dense<0.000000e+00> : vector<32xf32>
    %106 = vector.multi_reduction <add>, %105, %cst_43 [0] : vector<16x32xf32> to vector<32xf32>
    %107 = vector.shape_cast %106 : vector<32xf32> to vector<1x32xf32>
    %cst_44 = arith.constant 6.250000e-02 : f32
    %108 = vector.broadcast %cst_44 : f32 to vector<1x32xf32>
    %109 = arith.mulf %107, %108 : vector<1x32xf32>
    %cst_45 = arith.constant 0.000000e+00 : f32
    %110 = vector.broadcast %cst_45 : f32 to vector<1x32xf32>
    %111 = arith.maximumf %109, %110 : vector<1x32xf32>
    %112 = vector.extract_strided_slice %98 {offsets = [0, 0], sizes = [1, 32], strides = [1, 1]} : vector<2x32xf32> to vector<1x32xf32>
    %cst_46 = arith.constant 9.99999974E-6 : f32
    %113 = vector.broadcast %cst_46 : f32 to vector<1x32xf32>
    %114 = arith.addf %111, %113 : vector<1x32xf32>
    %115 = math.rsqrt %114 : vector<1x32xf32>
    %116 = arith.mulf %112, %115 : vector<1x32xf32>
    %117 = vector.broadcast %116 : vector<1x32xf32> to vector<16x32xf32>
    %118 = arith.mulf %104, %117 : vector<16x32xf32>
    %119 = vector.extract_strided_slice %98 {offsets = [1, 0], sizes = [1, 32], strides = [1, 1]} : vector<2x32xf32> to vector<1x32xf32>
    %120 = vector.broadcast %119 : vector<1x32xf32> to vector<16x32xf32>
    %121 = arith.addf %118, %120 : vector<16x32xf32>
    %cst_47 = arith.constant 0.000000e+00 : f32
    %122 = vector.broadcast %cst_47 : f32 to vector<16x32xf32>
    %123 = arith.maximumf %121, %122 : vector<16x32xf32>
    %124 = arith.truncf %123 : vector<16x32xf32> to vector<16x32xbf16>
    %c0_48 = arith.constant 0 : index
    %c0_49 = arith.constant 0 : index
    %125 = vector.load %arg11[%c0_48, %c0_49] : memref<32x64xbf16, #tpu.memory_space<vmem>>, vector<32x64xbf16>
    %cst_50 = arith.constant dense<0.000000e+00> : vector<16x64xf32>
    %126 = tpu.matmul %124, %125, %cst_50 {dimension_numbers = #tpu.dot_dimension_numbers<[1], [0], [0], [1], [0, 0, 1, 1], [], []>} : vector<16x32xbf16>, vector<32x64xbf16>, vector<16x64xf32> -> vector<16x64xf32>
    %127 = vector.extract_strided_slice %126 {offsets = [0, 0], sizes = [16, 16], strides = [1, 1]} : vector<16x64xf32> to vector<16x16xf32>
    %128 = vector.extract_strided_slice %126 {offsets = [0, 16], sizes = [16, 16], strides = [1, 1]} : vector<16x64xf32> to vector<16x16xf32>
    %129 = vector.extract_strided_slice %126 {offsets = [0, 32], sizes = [16, 16], strides = [1, 1]} : vector<16x64xf32> to vector<16x16xf32>
    %130 = vector.extract_strided_slice %126 {offsets = [0, 48], sizes = [16, 16], strides = [1, 1]} : vector<16x64xf32> to vector<16x16xf32>
    %cst_51 = arith.constant 0.000000e+00 : f32
    %131 = vector.broadcast %cst_51 : f32 to vector<2x16xf32>
    %132 = vector.extract_strided_slice %130 {offsets = [0, 0], sizes = [14, 16], strides = [1, 1]} : vector<16x16xf32> to vector<14x16xf32>
    %133 = tpu.concatenate %131, %132 in 0 : vector<2x16xf32>, vector<14x16xf32> -> vector<16x16xf32>
    %134 = vector.extract_strided_slice %127 {offsets = [2, 0], sizes = [14, 16], strides = [1, 1]} : vector<16x16xf32> to vector<14x16xf32>
    %135 = tpu.concatenate %134, %131 in 0 : vector<14x16xf32>, vector<2x16xf32> -> vector<16x16xf32>
    %136 = arith.addf %128, %133 : vector<16x16xf32>
    %137 = arith.addf %129, %135 : vector<16x16xf32>
    %138 = vector.extract_strided_slice %136 {offsets = [0, 0], sizes = [2, 16], strides = [1, 1]} : vector<16x16xf32> to vector<2x16xf32>
    %139 = vector.extract_strided_slice %137 {offsets = [0, 0], sizes = [2, 16], strides = [1, 1]} : vector<16x16xf32> to vector<2x16xf32>
    %140 = vector.extract_strided_slice %136 {offsets = [2, 0], sizes = [2, 16], strides = [1, 1]} : vector<16x16xf32> to vector<2x16xf32>
    %141 = vector.extract_strided_slice %137 {offsets = [2, 0], sizes = [2, 16], strides = [1, 1]} : vector<16x16xf32> to vector<2x16xf32>
    %142 = vector.extract_strided_slice %136 {offsets = [4, 0], sizes = [2, 16], strides = [1, 1]} : vector<16x16xf32> to vector<2x16xf32>
    %143 = vector.extract_strided_slice %137 {offsets = [4, 0], sizes = [2, 16], strides = [1, 1]} : vector<16x16xf32> to vector<2x16xf32>
    %144 = vector.extract_strided_slice %136 {offsets = [6, 0], sizes = [2, 16], strides = [1, 1]} : vector<16x16xf32> to vector<2x16xf32>
    %145 = vector.extract_strided_slice %137 {offsets = [6, 0], sizes = [2, 16], strides = [1, 1]} : vector<16x16xf32> to vector<2x16xf32>
    %146 = vector.extract_strided_slice %136 {offsets = [8, 0], sizes = [2, 16], strides = [1, 1]} : vector<16x16xf32> to vector<2x16xf32>
    %147 = vector.extract_strided_slice %137 {offsets = [8, 0], sizes = [2, 16], strides = [1, 1]} : vector<16x16xf32> to vector<2x16xf32>
    %148 = vector.extract_strided_slice %136 {offsets = [10, 0], sizes = [2, 16], strides = [1, 1]} : vector<16x16xf32> to vector<2x16xf32>
    %149 = vector.extract_strided_slice %137 {offsets = [10, 0], sizes = [2, 16], strides = [1, 1]} : vector<16x16xf32> to vector<2x16xf32>
    %150 = vector.extract_strided_slice %136 {offsets = [12, 0], sizes = [2, 16], strides = [1, 1]} : vector<16x16xf32> to vector<2x16xf32>
    %151 = vector.extract_strided_slice %137 {offsets = [12, 0], sizes = [2, 16], strides = [1, 1]} : vector<16x16xf32> to vector<2x16xf32>
    %152 = vector.extract_strided_slice %136 {offsets = [14, 0], sizes = [2, 16], strides = [1, 1]} : vector<16x16xf32> to vector<2x16xf32>
    %153 = vector.extract_strided_slice %137 {offsets = [14, 0], sizes = [2, 16], strides = [1, 1]} : vector<16x16xf32> to vector<2x16xf32>
    %154 = tpu.concatenate %138, %139, %140, %141, %142, %143, %144, %145, %146, %147, %148, %149, %150, %151, %152, %153 in 0 : vector<2x16xf32>, vector<2x16xf32>, vector<2x16xf32>, vector<2x16xf32>, vector<2x16xf32>, vector<2x16xf32>, vector<2x16xf32>, vector<2x16xf32>, vector<2x16xf32>, vector<2x16xf32>, vector<2x16xf32>, vector<2x16xf32>, vector<2x16xf32>, vector<2x16xf32>, vector<2x16xf32>, vector<2x16xf32> -> vector<32x16xf32>
    %c0_52 = arith.constant 0 : index
    %c0_53 = arith.constant 0 : index
    %155 = vector.load %arg12[%c0_52, %c0_53] : memref<2x16xf32, #tpu.memory_space<vmem>>, vector<2x16xf32>
    %cst_54 = arith.constant dense<0.000000e+00> : vector<16xf32>
    %156 = vector.multi_reduction <add>, %154, %cst_54 [0] : vector<32x16xf32> to vector<16xf32>
    %157 = vector.shape_cast %156 : vector<16xf32> to vector<1x16xf32>
    %cst_55 = arith.constant 3.125000e-02 : f32
    %158 = vector.broadcast %cst_55 : f32 to vector<1x16xf32>
    %159 = arith.mulf %157, %158 : vector<1x16xf32>
    %160 = vector.broadcast %159 : vector<1x16xf32> to vector<32x16xf32>
    %161 = arith.subf %154, %160 : vector<32x16xf32>
    %162 = arith.mulf %161, %161 : vector<32x16xf32>
    %cst_56 = arith.constant dense<0.000000e+00> : vector<16xf32>
    %163 = vector.multi_reduction <add>, %162, %cst_56 [0] : vector<32x16xf32> to vector<16xf32>
    %164 = vector.shape_cast %163 : vector<16xf32> to vector<1x16xf32>
    %cst_57 = arith.constant 3.125000e-02 : f32
    %165 = vector.broadcast %cst_57 : f32 to vector<1x16xf32>
    %166 = arith.mulf %164, %165 : vector<1x16xf32>
    %cst_58 = arith.constant 0.000000e+00 : f32
    %167 = vector.broadcast %cst_58 : f32 to vector<1x16xf32>
    %168 = arith.maximumf %166, %167 : vector<1x16xf32>
    %169 = vector.extract_strided_slice %155 {offsets = [0, 0], sizes = [1, 16], strides = [1, 1]} : vector<2x16xf32> to vector<1x16xf32>
    %cst_59 = arith.constant 9.99999974E-6 : f32
    %170 = vector.broadcast %cst_59 : f32 to vector<1x16xf32>
    %171 = arith.addf %168, %170 : vector<1x16xf32>
    %172 = math.rsqrt %171 : vector<1x16xf32>
    %173 = arith.mulf %169, %172 : vector<1x16xf32>
    %174 = vector.broadcast %173 : vector<1x16xf32> to vector<32x16xf32>
    %175 = arith.mulf %161, %174 : vector<32x16xf32>
    %176 = vector.extract_strided_slice %155 {offsets = [1, 0], sizes = [1, 16], strides = [1, 1]} : vector<2x16xf32> to vector<1x16xf32>
    %177 = vector.broadcast %176 : vector<1x16xf32> to vector<32x16xf32>
    %178 = arith.addf %175, %177 : vector<32x16xf32>
    %cst_60 = arith.constant 0.000000e+00 : f32
    %179 = vector.broadcast %cst_60 : f32 to vector<32x16xf32>
    %180 = arith.maximumf %178, %179 : vector<32x16xf32>
    %181 = arith.truncf %180 : vector<32x16xf32> to vector<32x16xbf16>
    %c0_61 = arith.constant 0 : index
    %c0_62 = arith.constant 0 : index
    %182 = vector.load %arg13[%c0_61, %c0_62] : memref<16x32xbf16, #tpu.memory_space<vmem>>, vector<16x32xbf16>
    %cst_63 = arith.constant dense<0.000000e+00> : vector<32x32xf32>
    %183 = tpu.matmul %181, %182, %cst_63 {dimension_numbers = #tpu.dot_dimension_numbers<[1], [0], [0], [1], [0, 0, 1, 1], [], []>} : vector<32x16xbf16>, vector<16x32xbf16>, vector<32x32xf32> -> vector<32x32xf32>
    %184 = vector.extract_strided_slice %183 {offsets = [0, 0], sizes = [32, 8], strides = [1, 1]} : vector<32x32xf32> to vector<32x8xf32>
    %185 = vector.extract_strided_slice %183 {offsets = [0, 8], sizes = [32, 8], strides = [1, 1]} : vector<32x32xf32> to vector<32x8xf32>
    %186 = vector.extract_strided_slice %183 {offsets = [0, 16], sizes = [32, 8], strides = [1, 1]} : vector<32x32xf32> to vector<32x8xf32>
    %187 = vector.extract_strided_slice %183 {offsets = [0, 24], sizes = [32, 8], strides = [1, 1]} : vector<32x32xf32> to vector<32x8xf32>
    %cst_64 = arith.constant 0.000000e+00 : f32
    %188 = vector.broadcast %cst_64 : f32 to vector<2x8xf32>
    %189 = vector.extract_strided_slice %187 {offsets = [0, 0], sizes = [30, 8], strides = [1, 1]} : vector<32x8xf32> to vector<30x8xf32>
    %190 = tpu.concatenate %188, %189 in 0 : vector<2x8xf32>, vector<30x8xf32> -> vector<32x8xf32>
    %191 = vector.extract_strided_slice %184 {offsets = [2, 0], sizes = [30, 8], strides = [1, 1]} : vector<32x8xf32> to vector<30x8xf32>
    %192 = tpu.concatenate %191, %188 in 0 : vector<30x8xf32>, vector<2x8xf32> -> vector<32x8xf32>
    %193 = arith.addf %185, %190 : vector<32x8xf32>
    %194 = arith.addf %186, %192 : vector<32x8xf32>
    %195 = vector.extract_strided_slice %193 {offsets = [0, 0], sizes = [2, 8], strides = [1, 1]} : vector<32x8xf32> to vector<2x8xf32>
    %196 = vector.extract_strided_slice %194 {offsets = [0, 0], sizes = [2, 8], strides = [1, 1]} : vector<32x8xf32> to vector<2x8xf32>
    %197 = vector.extract_strided_slice %193 {offsets = [2, 0], sizes = [2, 8], strides = [1, 1]} : vector<32x8xf32> to vector<2x8xf32>
    %198 = vector.extract_strided_slice %194 {offsets = [2, 0], sizes = [2, 8], strides = [1, 1]} : vector<32x8xf32> to vector<2x8xf32>
    %199 = vector.extract_strided_slice %193 {offsets = [4, 0], sizes = [2, 8], strides = [1, 1]} : vector<32x8xf32> to vector<2x8xf32>
    %200 = vector.extract_strided_slice %194 {offsets = [4, 0], sizes = [2, 8], strides = [1, 1]} : vector<32x8xf32> to vector<2x8xf32>
    %201 = vector.extract_strided_slice %193 {offsets = [6, 0], sizes = [2, 8], strides = [1, 1]} : vector<32x8xf32> to vector<2x8xf32>
    %202 = vector.extract_strided_slice %194 {offsets = [6, 0], sizes = [2, 8], strides = [1, 1]} : vector<32x8xf32> to vector<2x8xf32>
    %203 = vector.extract_strided_slice %193 {offsets = [8, 0], sizes = [2, 8], strides = [1, 1]} : vector<32x8xf32> to vector<2x8xf32>
    %204 = vector.extract_strided_slice %194 {offsets = [8, 0], sizes = [2, 8], strides = [1, 1]} : vector<32x8xf32> to vector<2x8xf32>
    %205 = vector.extract_strided_slice %193 {offsets = [10, 0], sizes = [2, 8], strides = [1, 1]} : vector<32x8xf32> to vector<2x8xf32>
    %206 = vector.extract_strided_slice %194 {offsets = [10, 0], sizes = [2, 8], strides = [1, 1]} : vector<32x8xf32> to vector<2x8xf32>
    %207 = vector.extract_strided_slice %193 {offsets = [12, 0], sizes = [2, 8], strides = [1, 1]} : vector<32x8xf32> to vector<2x8xf32>
    %208 = vector.extract_strided_slice %194 {offsets = [12, 0], sizes = [2, 8], strides = [1, 1]} : vector<32x8xf32> to vector<2x8xf32>
    %209 = vector.extract_strided_slice %193 {offsets = [14, 0], sizes = [2, 8], strides = [1, 1]} : vector<32x8xf32> to vector<2x8xf32>
    %210 = vector.extract_strided_slice %194 {offsets = [14, 0], sizes = [2, 8], strides = [1, 1]} : vector<32x8xf32> to vector<2x8xf32>
    %211 = vector.extract_strided_slice %193 {offsets = [16, 0], sizes = [2, 8], strides = [1, 1]} : vector<32x8xf32> to vector<2x8xf32>
    %212 = vector.extract_strided_slice %194 {offsets = [16, 0], sizes = [2, 8], strides = [1, 1]} : vector<32x8xf32> to vector<2x8xf32>
    %213 = vector.extract_strided_slice %193 {offsets = [18, 0], sizes = [2, 8], strides = [1, 1]} : vector<32x8xf32> to vector<2x8xf32>
    %214 = vector.extract_strided_slice %194 {offsets = [18, 0], sizes = [2, 8], strides = [1, 1]} : vector<32x8xf32> to vector<2x8xf32>
    %215 = vector.extract_strided_slice %193 {offsets = [20, 0], sizes = [2, 8], strides = [1, 1]} : vector<32x8xf32> to vector<2x8xf32>
    %216 = vector.extract_strided_slice %194 {offsets = [20, 0], sizes = [2, 8], strides = [1, 1]} : vector<32x8xf32> to vector<2x8xf32>
    %217 = vector.extract_strided_slice %193 {offsets = [22, 0], sizes = [2, 8], strides = [1, 1]} : vector<32x8xf32> to vector<2x8xf32>
    %218 = vector.extract_strided_slice %194 {offsets = [22, 0], sizes = [2, 8], strides = [1, 1]} : vector<32x8xf32> to vector<2x8xf32>
    %219 = vector.extract_strided_slice %193 {offsets = [24, 0], sizes = [2, 8], strides = [1, 1]} : vector<32x8xf32> to vector<2x8xf32>
    %220 = vector.extract_strided_slice %194 {offsets = [24, 0], sizes = [2, 8], strides = [1, 1]} : vector<32x8xf32> to vector<2x8xf32>
    %221 = vector.extract_strided_slice %193 {offsets = [26, 0], sizes = [2, 8], strides = [1, 1]} : vector<32x8xf32> to vector<2x8xf32>
    %222 = vector.extract_strided_slice %194 {offsets = [26, 0], sizes = [2, 8], strides = [1, 1]} : vector<32x8xf32> to vector<2x8xf32>
    %223 = vector.extract_strided_slice %193 {offsets = [28, 0], sizes = [2, 8], strides = [1, 1]} : vector<32x8xf32> to vector<2x8xf32>
    %224 = vector.extract_strided_slice %194 {offsets = [28, 0], sizes = [2, 8], strides = [1, 1]} : vector<32x8xf32> to vector<2x8xf32>
    %225 = vector.extract_strided_slice %193 {offsets = [30, 0], sizes = [2, 8], strides = [1, 1]} : vector<32x8xf32> to vector<2x8xf32>
    %226 = vector.extract_strided_slice %194 {offsets = [30, 0], sizes = [2, 8], strides = [1, 1]} : vector<32x8xf32> to vector<2x8xf32>
    %227 = tpu.concatenate %195, %196, %197, %198, %199, %200, %201, %202, %203, %204, %205, %206, %207, %208, %209, %210 in 0 : vector<2x8xf32>, vector<2x8xf32>, vector<2x8xf32>, vector<2x8xf32>, vector<2x8xf32>, vector<2x8xf32>, vector<2x8xf32>, vector<2x8xf32>, vector<2x8xf32>, vector<2x8xf32>, vector<2x8xf32>, vector<2x8xf32>, vector<2x8xf32>, vector<2x8xf32>, vector<2x8xf32>, vector<2x8xf32> -> vector<32x8xf32>
    %228 = tpu.concatenate %211, %212, %213, %214, %215, %216, %217, %218, %219, %220, %221, %222, %223, %224, %225, %226 in 0 : vector<2x8xf32>, vector<2x8xf32>, vector<2x8xf32>, vector<2x8xf32>, vector<2x8xf32>, vector<2x8xf32>, vector<2x8xf32>, vector<2x8xf32>, vector<2x8xf32>, vector<2x8xf32>, vector<2x8xf32>, vector<2x8xf32>, vector<2x8xf32>, vector<2x8xf32>, vector<2x8xf32>, vector<2x8xf32> -> vector<32x8xf32>
    %229 = tpu.concatenate %227, %228 in 0 : vector<32x8xf32>, vector<32x8xf32> -> vector<64x8xf32>
    %c0_65 = arith.constant 0 : index
    %c0_66 = arith.constant 0 : index
    %230 = vector.load %arg14[%c0_65, %c0_66] : memref<2x8xf32, #tpu.memory_space<vmem>>, vector<2x8xf32>
    %cst_67 = arith.constant dense<0.000000e+00> : vector<8xf32>
    %231 = vector.multi_reduction <add>, %229, %cst_67 [0] : vector<64x8xf32> to vector<8xf32>
    %232 = vector.shape_cast %231 : vector<8xf32> to vector<1x8xf32>
    %cst_68 = arith.constant 1.562500e-02 : f32
    %233 = vector.broadcast %cst_68 : f32 to vector<1x8xf32>
    %234 = arith.mulf %232, %233 : vector<1x8xf32>
    %235 = vector.broadcast %234 : vector<1x8xf32> to vector<64x8xf32>
    %236 = arith.subf %229, %235 : vector<64x8xf32>
    %237 = arith.mulf %236, %236 : vector<64x8xf32>
    %cst_69 = arith.constant dense<0.000000e+00> : vector<8xf32>
    %238 = vector.multi_reduction <add>, %237, %cst_69 [0] : vector<64x8xf32> to vector<8xf32>
    %239 = vector.shape_cast %238 : vector<8xf32> to vector<1x8xf32>
    %cst_70 = arith.constant 1.562500e-02 : f32
    %240 = vector.broadcast %cst_70 : f32 to vector<1x8xf32>
    %241 = arith.mulf %239, %240 : vector<1x8xf32>
    %cst_71 = arith.constant 0.000000e+00 : f32
    %242 = vector.broadcast %cst_71 : f32 to vector<1x8xf32>
    %243 = arith.maximumf %241, %242 : vector<1x8xf32>
    %244 = vector.extract_strided_slice %230 {offsets = [0, 0], sizes = [1, 8], strides = [1, 1]} : vector<2x8xf32> to vector<1x8xf32>
    %cst_72 = arith.constant 9.99999974E-6 : f32
    %245 = vector.broadcast %cst_72 : f32 to vector<1x8xf32>
    %246 = arith.addf %243, %245 : vector<1x8xf32>
    %247 = math.rsqrt %246 : vector<1x8xf32>
    %248 = arith.mulf %244, %247 : vector<1x8xf32>
    %249 = vector.broadcast %248 : vector<1x8xf32> to vector<64x8xf32>
    %250 = arith.mulf %236, %249 : vector<64x8xf32>
    %251 = vector.extract_strided_slice %230 {offsets = [1, 0], sizes = [1, 8], strides = [1, 1]} : vector<2x8xf32> to vector<1x8xf32>
    %252 = vector.broadcast %251 : vector<1x8xf32> to vector<64x8xf32>
    %253 = arith.addf %250, %252 : vector<64x8xf32>
    %cst_73 = arith.constant 0.000000e+00 : f32
    %254 = vector.broadcast %cst_73 : f32 to vector<64x8xf32>
    %255 = arith.maximumf %253, %254 : vector<64x8xf32>
    %256 = arith.truncf %255 : vector<64x8xf32> to vector<64x8xbf16>
    %257 = vector.extract_strided_slice %256 {offsets = [0, 0], sizes = [2, 8], strides = [1, 1]} : vector<64x8xbf16> to vector<2x8xbf16>
    %c0_74 = arith.constant 0 : index
    %c0_75 = arith.constant 0 : index
    %258 = vector.load %arg18[%c0_74, %c0_75] : memref<2x256xbf16, #tpu.memory_space<vmem>>, vector<2x8xbf16>
    tpu.vector_store %arg18[%c0_74, %c0_75], %257 {strides = array<i32>} : memref<2x256xbf16, #tpu.memory_space<vmem>>, vector<2x8xbf16>,
    %259 = vector.extract_strided_slice %256 {offsets = [2, 0], sizes = [2, 8], strides = [1, 1]} : vector<64x8xbf16> to vector<2x8xbf16>
    %c0_76 = arith.constant 0 : index
    %c8 = arith.constant 8 : index
    %260 = vector.load %arg18[%c0_76, %c8] : memref<2x256xbf16, #tpu.memory_space<vmem>>, vector<2x8xbf16>
    tpu.vector_store %arg18[%c0_76, %c8], %259 {strides = array<i32>} : memref<2x256xbf16, #tpu.memory_space<vmem>>, vector<2x8xbf16>,
    %261 = vector.extract_strided_slice %256 {offsets = [4, 0], sizes = [2, 8], strides = [1, 1]} : vector<64x8xbf16> to vector<2x8xbf16>
    %c0_77 = arith.constant 0 : index
    %c16 = arith.constant 16 : index
    %262 = vector.load %arg18[%c0_77, %c16] : memref<2x256xbf16, #tpu.memory_space<vmem>>, vector<2x8xbf16>
    tpu.vector_store %arg18[%c0_77, %c16], %261 {strides = array<i32>} : memref<2x256xbf16, #tpu.memory_space<vmem>>, vector<2x8xbf16>,
    %263 = vector.extract_strided_slice %256 {offsets = [6, 0], sizes = [2, 8], strides = [1, 1]} : vector<64x8xbf16> to vector<2x8xbf16>
    %c0_78 = arith.constant 0 : index
    %c24 = arith.constant 24 : index
    %264 = vector.load %arg18[%c0_78, %c24] : memref<2x256xbf16, #tpu.memory_space<vmem>>, vector<2x8xbf16>
    tpu.vector_store %arg18[%c0_78, %c24], %263 {strides = array<i32>} : memref<2x256xbf16, #tpu.memory_space<vmem>>, vector<2x8xbf16>,
    %265 = vector.extract_strided_slice %256 {offsets = [8, 0], sizes = [2, 8], strides = [1, 1]} : vector<64x8xbf16> to vector<2x8xbf16>
    %c0_79 = arith.constant 0 : index
    %c32 = arith.constant 32 : index
    %266 = vector.load %arg18[%c0_79, %c32] : memref<2x256xbf16, #tpu.memory_space<vmem>>, vector<2x8xbf16>
    tpu.vector_store %arg18[%c0_79, %c32], %265 {strides = array<i32>} : memref<2x256xbf16, #tpu.memory_space<vmem>>, vector<2x8xbf16>,
    %267 = vector.extract_strided_slice %256 {offsets = [10, 0], sizes = [2, 8], strides = [1, 1]} : vector<64x8xbf16> to vector<2x8xbf16>
    %c0_80 = arith.constant 0 : index
    %c40 = arith.constant 40 : index
    %268 = vector.load %arg18[%c0_80, %c40] : memref<2x256xbf16, #tpu.memory_space<vmem>>, vector<2x8xbf16>
    tpu.vector_store %arg18[%c0_80, %c40], %267 {strides = array<i32>} : memref<2x256xbf16, #tpu.memory_space<vmem>>, vector<2x8xbf16>,
    %269 = vector.extract_strided_slice %256 {offsets = [12, 0], sizes = [2, 8], strides = [1, 1]} : vector<64x8xbf16> to vector<2x8xbf16>
    %c0_81 = arith.constant 0 : index
    %c48 = arith.constant 48 : index
    %270 = vector.load %arg18[%c0_81, %c48] : memref<2x256xbf16, #tpu.memory_space<vmem>>, vector<2x8xbf16>
    tpu.vector_store %arg18[%c0_81, %c48], %269 {strides = array<i32>} : memref<2x256xbf16, #tpu.memory_space<vmem>>, vector<2x8xbf16>,
    %271 = vector.extract_strided_slice %256 {offsets = [14, 0], sizes = [2, 8], strides = [1, 1]} : vector<64x8xbf16> to vector<2x8xbf16>
    %c0_82 = arith.constant 0 : index
    %c56 = arith.constant 56 : index
    %272 = vector.load %arg18[%c0_82, %c56] : memref<2x256xbf16, #tpu.memory_space<vmem>>, vector<2x8xbf16>
    tpu.vector_store %arg18[%c0_82, %c56], %271 {strides = array<i32>} : memref<2x256xbf16, #tpu.memory_space<vmem>>, vector<2x8xbf16>,
    %273 = vector.extract_strided_slice %256 {offsets = [16, 0], sizes = [2, 8], strides = [1, 1]} : vector<64x8xbf16> to vector<2x8xbf16>
    %c0_83 = arith.constant 0 : index
    %c64 = arith.constant 64 : index
    %274 = vector.load %arg18[%c0_83, %c64] : memref<2x256xbf16, #tpu.memory_space<vmem>>, vector<2x8xbf16>
    tpu.vector_store %arg18[%c0_83, %c64], %273 {strides = array<i32>} : memref<2x256xbf16, #tpu.memory_space<vmem>>, vector<2x8xbf16>,
    %275 = vector.extract_strided_slice %256 {offsets = [18, 0], sizes = [2, 8], strides = [1, 1]} : vector<64x8xbf16> to vector<2x8xbf16>
    %c0_84 = arith.constant 0 : index
    %c72 = arith.constant 72 : index
    %276 = vector.load %arg18[%c0_84, %c72] : memref<2x256xbf16, #tpu.memory_space<vmem>>, vector<2x8xbf16>
    tpu.vector_store %arg18[%c0_84, %c72], %275 {strides = array<i32>} : memref<2x256xbf16, #tpu.memory_space<vmem>>, vector<2x8xbf16>,
    %277 = vector.extract_strided_slice %256 {offsets = [20, 0], sizes = [2, 8], strides = [1, 1]} : vector<64x8xbf16> to vector<2x8xbf16>
    %c0_85 = arith.constant 0 : index
    %c80 = arith.constant 80 : index
    %278 = vector.load %arg18[%c0_85, %c80] : memref<2x256xbf16, #tpu.memory_space<vmem>>, vector<2x8xbf16>
    tpu.vector_store %arg18[%c0_85, %c80], %277 {strides = array<i32>} : memref<2x256xbf16, #tpu.memory_space<vmem>>, vector<2x8xbf16>,
    %279 = vector.extract_strided_slice %256 {offsets = [22, 0], sizes = [2, 8], strides = [1, 1]} : vector<64x8xbf16> to vector<2x8xbf16>
    %c0_86 = arith.constant 0 : index
    %c88 = arith.constant 88 : index
    %280 = vector.load %arg18[%c0_86, %c88] : memref<2x256xbf16, #tpu.memory_space<vmem>>, vector<2x8xbf16>
    tpu.vector_store %arg18[%c0_86, %c88], %279 {strides = array<i32>} : memref<2x256xbf16, #tpu.memory_space<vmem>>, vector<2x8xbf16>,
    %281 = vector.extract_strided_slice %256 {offsets = [24, 0], sizes = [2, 8], strides = [1, 1]} : vector<64x8xbf16> to vector<2x8xbf16>
    %c0_87 = arith.constant 0 : index
    %c96 = arith.constant 96 : index
    %282 = vector.load %arg18[%c0_87, %c96] : memref<2x256xbf16, #tpu.memory_space<vmem>>, vector<2x8xbf16>
    tpu.vector_store %arg18[%c0_87, %c96], %281 {strides = array<i32>} : memref<2x256xbf16, #tpu.memory_space<vmem>>, vector<2x8xbf16>,
    %283 = vector.extract_strided_slice %256 {offsets = [26, 0], sizes = [2, 8], strides = [1, 1]} : vector<64x8xbf16> to vector<2x8xbf16>
    %c0_88 = arith.constant 0 : index
    %c104 = arith.constant 104 : index
    %284 = vector.load %arg18[%c0_88, %c104] : memref<2x256xbf16, #tpu.memory_space<vmem>>, vector<2x8xbf16>
    tpu.vector_store %arg18[%c0_88, %c104], %283 {strides = array<i32>} : memref<2x256xbf16, #tpu.memory_space<vmem>>, vector<2x8xbf16>,
    %285 = vector.extract_strided_slice %256 {offsets = [28, 0], sizes = [2, 8], strides = [1, 1]} : vector<64x8xbf16> to vector<2x8xbf16>
    %c0_89 = arith.constant 0 : index
    %c112 = arith.constant 112 : index
    %286 = vector.load %arg18[%c0_89, %c112] : memref<2x256xbf16, #tpu.memory_space<vmem>>, vector<2x8xbf16>
    tpu.vector_store %arg18[%c0_89, %c112], %285 {strides = array<i32>} : memref<2x256xbf16, #tpu.memory_space<vmem>>, vector<2x8xbf16>,
    %287 = vector.extract_strided_slice %256 {offsets = [30, 0], sizes = [2, 8], strides = [1, 1]} : vector<64x8xbf16> to vector<2x8xbf16>
    %c0_90 = arith.constant 0 : index
    %c120 = arith.constant 120 : index
    %288 = vector.load %arg18[%c0_90, %c120] : memref<2x256xbf16, #tpu.memory_space<vmem>>, vector<2x8xbf16>
    tpu.vector_store %arg18[%c0_90, %c120], %287 {strides = array<i32>} : memref<2x256xbf16, #tpu.memory_space<vmem>>, vector<2x8xbf16>,
    %289 = vector.extract_strided_slice %256 {offsets = [32, 0], sizes = [2, 8], strides = [1, 1]} : vector<64x8xbf16> to vector<2x8xbf16>
    %c0_91 = arith.constant 0 : index
    %c128 = arith.constant 128 : index
    %290 = vector.load %arg18[%c0_91, %c128] : memref<2x256xbf16, #tpu.memory_space<vmem>>, vector<2x8xbf16>
    tpu.vector_store %arg18[%c0_91, %c128], %289 {strides = array<i32>} : memref<2x256xbf16, #tpu.memory_space<vmem>>, vector<2x8xbf16>,
    %291 = vector.extract_strided_slice %256 {offsets = [34, 0], sizes = [2, 8], strides = [1, 1]} : vector<64x8xbf16> to vector<2x8xbf16>
    %c0_92 = arith.constant 0 : index
    %c136 = arith.constant 136 : index
    %292 = vector.load %arg18[%c0_92, %c136] : memref<2x256xbf16, #tpu.memory_space<vmem>>, vector<2x8xbf16>
    tpu.vector_store %arg18[%c0_92, %c136], %291 {strides = array<i32>} : memref<2x256xbf16, #tpu.memory_space<vmem>>, vector<2x8xbf16>,
    %293 = vector.extract_strided_slice %256 {offsets = [36, 0], sizes = [2, 8], strides = [1, 1]} : vector<64x8xbf16> to vector<2x8xbf16>
    %c0_93 = arith.constant 0 : index
    %c144 = arith.constant 144 : index
    %294 = vector.load %arg18[%c0_93, %c144] : memref<2x256xbf16, #tpu.memory_space<vmem>>, vector<2x8xbf16>
    tpu.vector_store %arg18[%c0_93, %c144], %293 {strides = array<i32>} : memref<2x256xbf16, #tpu.memory_space<vmem>>, vector<2x8xbf16>,
    %295 = vector.extract_strided_slice %256 {offsets = [38, 0], sizes = [2, 8], strides = [1, 1]} : vector<64x8xbf16> to vector<2x8xbf16>
    %c0_94 = arith.constant 0 : index
    %c152 = arith.constant 152 : index
    %296 = vector.load %arg18[%c0_94, %c152] : memref<2x256xbf16, #tpu.memory_space<vmem>>, vector<2x8xbf16>
    tpu.vector_store %arg18[%c0_94, %c152], %295 {strides = array<i32>} : memref<2x256xbf16, #tpu.memory_space<vmem>>, vector<2x8xbf16>,
    %297 = vector.extract_strided_slice %256 {offsets = [40, 0], sizes = [2, 8], strides = [1, 1]} : vector<64x8xbf16> to vector<2x8xbf16>
    %c0_95 = arith.constant 0 : index
    %c160 = arith.constant 160 : index
    %298 = vector.load %arg18[%c0_95, %c160] : memref<2x256xbf16, #tpu.memory_space<vmem>>, vector<2x8xbf16>
    tpu.vector_store %arg18[%c0_95, %c160], %297 {strides = array<i32>} : memref<2x256xbf16, #tpu.memory_space<vmem>>, vector<2x8xbf16>,
    %299 = vector.extract_strided_slice %256 {offsets = [42, 0], sizes = [2, 8], strides = [1, 1]} : vector<64x8xbf16> to vector<2x8xbf16>
    %c0_96 = arith.constant 0 : index
    %c168 = arith.constant 168 : index
    %300 = vector.load %arg18[%c0_96, %c168] : memref<2x256xbf16, #tpu.memory_space<vmem>>, vector<2x8xbf16>
    tpu.vector_store %arg18[%c0_96, %c168], %299 {strides = array<i32>} : memref<2x256xbf16, #tpu.memory_space<vmem>>, vector<2x8xbf16>,
    %301 = vector.extract_strided_slice %256 {offsets = [44, 0], sizes = [2, 8], strides = [1, 1]} : vector<64x8xbf16> to vector<2x8xbf16>
    %c0_97 = arith.constant 0 : index
    %c176 = arith.constant 176 : index
    %302 = vector.load %arg18[%c0_97, %c176] : memref<2x256xbf16, #tpu.memory_space<vmem>>, vector<2x8xbf16>
    tpu.vector_store %arg18[%c0_97, %c176], %301 {strides = array<i32>} : memref<2x256xbf16, #tpu.memory_space<vmem>>, vector<2x8xbf16>,
    %303 = vector.extract_strided_slice %256 {offsets = [46, 0], sizes = [2, 8], strides = [1, 1]} : vector<64x8xbf16> to vector<2x8xbf16>
    %c0_98 = arith.constant 0 : index
    %c184 = arith.constant 184 : index
    %304 = vector.load %arg18[%c0_98, %c184] : memref<2x256xbf16, #tpu.memory_space<vmem>>, vector<2x8xbf16>
    tpu.vector_store %arg18[%c0_98, %c184], %303 {strides = array<i32>} : memref<2x256xbf16, #tpu.memory_space<vmem>>, vector<2x8xbf16>,
    %305 = vector.extract_strided_slice %256 {offsets = [48, 0], sizes = [2, 8], strides = [1, 1]} : vector<64x8xbf16> to vector<2x8xbf16>
    %c0_99 = arith.constant 0 : index
    %c192 = arith.constant 192 : index
    %306 = vector.load %arg18[%c0_99, %c192] : memref<2x256xbf16, #tpu.memory_space<vmem>>, vector<2x8xbf16>
    tpu.vector_store %arg18[%c0_99, %c192], %305 {strides = array<i32>} : memref<2x256xbf16, #tpu.memory_space<vmem>>, vector<2x8xbf16>,
    %307 = vector.extract_strided_slice %256 {offsets = [50, 0], sizes = [2, 8], strides = [1, 1]} : vector<64x8xbf16> to vector<2x8xbf16>
    %c0_100 = arith.constant 0 : index
    %c200 = arith.constant 200 : index
    %308 = vector.load %arg18[%c0_100, %c200] : memref<2x256xbf16, #tpu.memory_space<vmem>>, vector<2x8xbf16>
    tpu.vector_store %arg18[%c0_100, %c200], %307 {strides = array<i32>} : memref<2x256xbf16, #tpu.memory_space<vmem>>, vector<2x8xbf16>,
    %309 = vector.extract_strided_slice %256 {offsets = [52, 0], sizes = [2, 8], strides = [1, 1]} : vector<64x8xbf16> to vector<2x8xbf16>
    %c0_101 = arith.constant 0 : index
    %c208 = arith.constant 208 : index
    %310 = vector.load %arg18[%c0_101, %c208] : memref<2x256xbf16, #tpu.memory_space<vmem>>, vector<2x8xbf16>
    tpu.vector_store %arg18[%c0_101, %c208], %309 {strides = array<i32>} : memref<2x256xbf16, #tpu.memory_space<vmem>>, vector<2x8xbf16>,
    %311 = vector.extract_strided_slice %256 {offsets = [54, 0], sizes = [2, 8], strides = [1, 1]} : vector<64x8xbf16> to vector<2x8xbf16>
    %c0_102 = arith.constant 0 : index
    %c216 = arith.constant 216 : index
    %312 = vector.load %arg18[%c0_102, %c216] : memref<2x256xbf16, #tpu.memory_space<vmem>>, vector<2x8xbf16>
    tpu.vector_store %arg18[%c0_102, %c216], %311 {strides = array<i32>} : memref<2x256xbf16, #tpu.memory_space<vmem>>, vector<2x8xbf16>,
    %313 = vector.extract_strided_slice %256 {offsets = [56, 0], sizes = [2, 8], strides = [1, 1]} : vector<64x8xbf16> to vector<2x8xbf16>
    %c0_103 = arith.constant 0 : index
    %c224 = arith.constant 224 : index
    %314 = vector.load %arg18[%c0_103, %c224] : memref<2x256xbf16, #tpu.memory_space<vmem>>, vector<2x8xbf16>
    tpu.vector_store %arg18[%c0_103, %c224], %313 {strides = array<i32>} : memref<2x256xbf16, #tpu.memory_space<vmem>>, vector<2x8xbf16>,
    %315 = vector.extract_strided_slice %256 {offsets = [58, 0], sizes = [2, 8], strides = [1, 1]} : vector<64x8xbf16> to vector<2x8xbf16>
    %c0_104 = arith.constant 0 : index
    %c232 = arith.constant 232 : index
    %316 = vector.load %arg18[%c0_104, %c232] : memref<2x256xbf16, #tpu.memory_space<vmem>>, vector<2x8xbf16>
    tpu.vector_store %arg18[%c0_104, %c232], %315 {strides = array<i32>} : memref<2x256xbf16, #tpu.memory_space<vmem>>, vector<2x8xbf16>,
    %317 = vector.extract_strided_slice %256 {offsets = [60, 0], sizes = [2, 8], strides = [1, 1]} : vector<64x8xbf16> to vector<2x8xbf16>
    %c0_105 = arith.constant 0 : index
    %c240 = arith.constant 240 : index
    %318 = vector.load %arg18[%c0_105, %c240] : memref<2x256xbf16, #tpu.memory_space<vmem>>, vector<2x8xbf16>
    tpu.vector_store %arg18[%c0_105, %c240], %317 {strides = array<i32>} : memref<2x256xbf16, #tpu.memory_space<vmem>>, vector<2x8xbf16>,
    %319 = vector.extract_strided_slice %256 {offsets = [62, 0], sizes = [2, 8], strides = [1, 1]} : vector<64x8xbf16> to vector<2x8xbf16>
    %c0_106 = arith.constant 0 : index
    %c248 = arith.constant 248 : index
    %320 = vector.load %arg18[%c0_106, %c248] : memref<2x256xbf16, #tpu.memory_space<vmem>>, vector<2x8xbf16>
    tpu.vector_store %arg18[%c0_106, %c248], %319 {strides = array<i32>} : memref<2x256xbf16, #tpu.memory_space<vmem>>, vector<2x8xbf16>,
    %c0_107 = arith.constant 0 : index
    %c0_108 = arith.constant 0 : index
    %321 = vector.load %arg18[%c0_107, %c0_108] : memref<2x256xbf16, #tpu.memory_space<vmem>>, vector<2x256xbf16>
    %c0_109 = arith.constant 0 : index
    %c0_110 = arith.constant 0 : index
    %322 = vector.load %arg15[%c0_109, %c0_110] : memref<256x128xbf16, #tpu.memory_space<vmem>>, vector<256x128xbf16>
    %cst_111 = arith.constant dense<0.000000e+00> : vector<2x128xf32>
    %323 = tpu.matmul %321, %322, %cst_111 {dimension_numbers = #tpu.dot_dimension_numbers<[1], [0], [0], [1], [0, 0, 1, 1], [], []>} : vector<2x256xbf16>, vector<256x128xbf16>, vector<2x128xf32> -> vector<2x128xf32>
    %c0_112 = arith.constant 0 : index
    %c0_113 = arith.constant 0 : index
    %324 = vector.load %arg16[%c0_112, %c0_113] : memref<1x128xf32, #tpu.memory_space<vmem>>, vector<1x128xf32>
    %325 = vector.broadcast %324 : vector<1x128xf32> to vector<2x128xf32>
    %326 = arith.addf %323, %325 : vector<2x128xf32>
    %cst_114 = arith.constant -1.000000e+00 : f32
    %cst_115 = arith.constant 1.000000e+00 : f32
    %327 = vector.broadcast %cst_114 : f32 to vector<2x128xf32>
    %328 = arith.maximumf %327, %326 : vector<2x128xf32>
    %329 = vector.broadcast %cst_115 : f32 to vector<2x128xf32>
    %330 = arith.minimumf %329, %328 : vector<2x128xf32>
    %c0_116 = arith.constant 0 : index
    %c0_117 = arith.constant 0 : index
    %331 = vector.load %arg17[%c0_116, %c0_117] : memref<2x128xf32, #tpu.memory_space<vmem>>, vector<2x128xf32>
    tpu.vector_store %arg17[%c0_116, %c0_117], %330 {strides = array<i32>} : memref<2x128xf32, #tpu.memory_space<vmem>>, vector<2x128xf32>,
    return
  }
}

</mosaic_0001>

<bundles_post_ra>
// kernel: gen_forward.1
= control target key start
LH: loop header
LB: loop body
LE: loop exit
PB: predicated region body
PF: predicated region fallthrough
CT: control target
= control target key end

     0   :  { %s2734_s0 = inlined_call_operand.vmem [shape: f32[2,8], index: 0, kind: input, shape index: {}]   ;;  %s2735_s1 = inlined_call_operand.hbm [shape: f32[2,5], index: 1, kind: input, shape index: {}]   ;;  %s2736_s2 = inlined_call_operand.hbm [shape: bf16[5,32], index: 2, kind: input, shape index: {}]   ;;  %s2737_s3 = inlined_call_operand.vmem [shape: f32[1,32], index: 3, kind: input, shape index: {}]   ;;  %s2738_s4 = inlined_call_operand.vmem [shape: bf16[32,4], index: 4, kind: input, shape index: {}]   ;;  %s2739_s5 = inlined_call_operand.hbm [shape: f32[1,4], index: 5, kind: input, shape index: {}]   ;;  %s2740_s6 = inlined_call_operand.hbm [shape: bf16[8,256], index: 6, kind: input, shape index: {}]   ;;  %s2741_s7 = inlined_call_operand.hbm [shape: bf16[4,256], index: 7, kind: input, shape index: {}]   ;;  %s2742_s8 = inlined_call_operand.hbm [shape: f32[2,64], index: 8, kind: input, shape index: {}]   ;;  %s2743_s9 = inlined_call_operand.vmem [shape: bf16[64,128], index: 9, kind: input, shape index: {}]   ;;  %s2744_s10 = inlined_call_operand.hbm [shape: f32[2,32], index: 10, kind: input, shape index: {}]   ;;  %s2745_s11 = inlined_call_operand.vmem [shape: bf16[32,64], index: 11, kind: input, shape index: {}]   ;;  %s2746_s12 = inlined_call_operand.vmem [shape: f32[2,16], index: 12, kind: input, shape index: {}]   ;;  %s2747_s13 = inlined_call_operand.vmem [shape: bf16[16,32], index: 13, kind: input, shape index: {}]   ;;  %s2748_s14 = inlined_call_operand.vmem [shape: f32[2,8], index: 14, kind: input, shape index: {}]   ;;  %s2749_s15 = inlined_call_operand.hbm [shape: bf16[256,128], index: 15, kind: input, shape index: {}]   ;;  %s2750_s16 = inlined_call_operand.vmem [shape: f32[1,128], index: 16, kind: input, shape index: {}]   ;;  %s2751_s17 = inlined_call_operand.vmem [shape: f32[2,128], index: 17, kind: output, shape index: {}]  }
   0x1   :  { %2753 = sst [smem:[#allocation21_spill]] %s2734_s0 }
   0x2   :  { %2754 = sst [smem:[#allocation22_spill]] %s2735_s1 }
   0x3   :  { %22 = vsyncpa [#allocation4], 0 }
   0x4   :  { %23 = vsyncpa [#allocation6], 0 }
   0x5   :  { %24 = vsyncpa [#allocation9], 0 }
   0x6   :  { %25 = vsyncpa [#allocation12], 0 }
   0x7   :  { %26 = vsyncpa [#allocation15], 0  ;;  %s2181_s24 = smov [#allocation5]   ;;  %s2182_s26 = smov [#allocation8]  }
   0x8   :  { %s45_s25 = sshll.u32 %s2181_s24, 4  ;;  %s69_s27 = sshll.u32 %s2182_s26, 4  ;;  %s46_s25 = int_to_ptr.vmem [resolvable:$true] %s45_s25  ;;  %s70_s27 = int_to_ptr.vmem [resolvable:$true] %s69_s27 }
   0x9   :  { %s1995_s0 = scalar_lea.hbm %s2736_s2, 64 }
   0xa   :  { %p1996_p0 = scmp.ne.s32.totalorder %s2736_s2, %s1995_s0  ;;  %p1999_p1 = scmp.lt.u32.totalorder %s1995_s0, %s2736_s2 }
   0xc   :  { %p2001_p2 = pnand %p1999_p1, %p1996_p0 }
   0xe   :  { %2004 = shalt.err (!%p2001_p2)
}
   0xf   :  { %s2005_s20 = scalar_lea.vmem %s46_s25, 64  ;;  %p2010_p4 = scmp.lt.s32.totalorder %s46_s25, %s46_s25 }
  0x10   :  { %p2006_p3 = scmp.ne.s32.totalorder %s46_s25, %s2005_s20  ;;  %p2011_p5 = scmp.lt.s32.totalorder %s2005_s20, %s2005_s20 }
  0x12   :  { %p2012_p6 = por %p2011_p5, %p2010_p4 }
  0x14   :  { %p2013_p7 = pnand %p2012_p6, %p2006_p3 }
  0x16   :  { %2016 = shalt.err (!%p2013_p7)
}
  0x17   :  { %48 = dma.hbm_to_vmem [thread:$0]  %s2736_s2, 64, %s46_s25, [#allocation6]  }
  0x18   :  { %s2017_s26 = scalar_lea.hbm %s2740_s6, 128 }
  0x19   :  { %p2018_p8 = scmp.ne.s32.totalorder %s2740_s6, %s2017_s26  ;;  %p2021_p9 = scmp.lt.u32.totalorder %s2017_s26, %s2740_s6 }
  0x1b   :  { %p2023_p10 = pnand %p2021_p9, %p2018_p8 }
  0x1d   :  { %2026 = shalt.err (!%p2023_p10)
}
  0x1e   :  { %s2027_s18 = scalar_lea.vmem %s70_s27, 128  ;;  %p2032_p12 = scmp.lt.s32.totalorder %s70_s27, %s70_s27 }
  0x1f   :  { %p2028_p11 = scmp.ne.s32.totalorder %s70_s27, %s2027_s18  ;;  %p2033_p13 = scmp.lt.s32.totalorder %s2027_s18, %s2027_s18 }
  0x21   :  { %p2034_p0 = por %p2033_p13, %p2032_p12 }
  0x23   :  { %p2035_p1 = pnand %p2034_p0, %p2028_p11 }
  0x25   :  { %2038 = shalt.err (!%p2035_p1)
}
  0x26   :  { %72 = dma.hbm_to_vmem [thread:$0]  %s2740_s6, 128, %s70_s27, [#allocation9]  }
  0x27   :  { %s2183_s19 = smov [#allocation11]   ;;  %s2184_s20 = smov [#allocation3]  }
  0x28   :  { %s89_s1 = sshll.u32 %s2183_s19, 4  ;;  %s35_s21 = sshll.u32 %s2184_s20, 4  ;;  %s90_s1 = int_to_ptr.vmem [resolvable:$true] %s89_s1  ;;  %s36_s21 = int_to_ptr.vmem [resolvable:$true] %s35_s21 }
  0x29   :  { %s2039_s24 = scalar_lea.hbm %s2742_s8, 32 }
  0x2a   :  { %p2040_p2 = scmp.ne.s32.totalorder %s2742_s8, %s2039_s24  ;;  %p2043_p3 = scmp.lt.u32.totalorder %s2039_s24, %s2742_s8 }
  0x2c   :  { %p2045_p4 = pnand %p2043_p3, %p2040_p2 }
  0x2e   :  { %2048 = shalt.err (!%p2045_p4)
}
  0x2f   :  { %s2049_s6 = scalar_lea.vmem %s90_s1, 32  ;;  %p2054_p6 = scmp.lt.s32.totalorder %s90_s1, %s90_s1 }
  0x30   :  { %p2050_p5 = scmp.ne.s32.totalorder %s90_s1, %s2049_s6  ;;  %p2055_p7 = scmp.lt.s32.totalorder %s2049_s6, %s2049_s6 }
  0x32   :  { %p2056_p8 = por %p2055_p7, %p2054_p6 }
  0x34   :  { %p2057_p9 = pnand %p2056_p8, %p2050_p5 }
  0x36   :  { %2060 = shalt.err (!%p2057_p9)
}
  0x37   :  { %92 = dma.hbm_to_vmem [thread:$0]  %s2742_s8, 32, %s90_s1, [#allocation12]  }
  0x38   :  { %s2755_s25 = sld [smem:[#allocation22_spill]] }
  0x3e   :  { %s2061_s19 = scalar_lea.hbm %s2755_s25, 32 }
  0x3f   :  { %p2062_p10 = scmp.ne.s32.totalorder %s2755_s25, %s2061_s19  ;;  %p2065_p11 = scmp.lt.u32.totalorder %s2061_s19, %s2755_s25 }
  0x41   :  { %p2067_p12 = pnand %p2065_p11, %p2062_p10 }
  0x43   :  { %2070 = shalt.err (!%p2067_p12)
}
  0x44   :  { %s2071_s26 = scalar_lea.vmem %s36_s21, 32  ;;  %p2076_p0 = scmp.lt.s32.totalorder %s36_s21, %s36_s21 }
  0x45   :  { %p2072_p13 = scmp.ne.s32.totalorder %s36_s21, %s2071_s26  ;;  %p2077_p1 = scmp.lt.s32.totalorder %s2071_s26, %s2071_s26 }
  0x47   :  { %p2078_p2 = por %p2077_p1, %p2076_p0 }
  0x49   :  { %p2079_p3 = pnand %p2078_p2, %p2072_p13 }
  0x4b   :  { %2082 = shalt.err (!%p2079_p3)
}
  0x4c   :  { %38 = dma.hbm_to_vmem [thread:$0]  %s2755_s25, 32, %s36_s21, [#allocation4]  }
  0x4d   :  { %s2185_s28 = smov [#allocation7]   ;;  %s2186_s0 = smov [#allocation10]  }
  0x4e   :  { %s59_s29 = sshll.u32 %s2185_s28, 4  ;;  %s79_s6 = sshll.u32 %s2186_s0, 4  ;;  %s60_s29 = int_to_ptr.vmem [resolvable:$true] %s59_s29  ;;  %s80_s6 = int_to_ptr.vmem [resolvable:$true] %s79_s6 }
  0x4f   :  { %s2083_s18 = scalar_lea.hbm %s2739_s5, 16 }
  0x50   :  { %p2084_p4 = scmp.ne.s32.totalorder %s2739_s5, %s2083_s18  ;;  %p2087_p5 = scmp.lt.u32.totalorder %s2083_s18, %s2739_s5 }
  0x52   :  { %p2089_p6 = pnand %p2087_p5, %p2084_p4 }
  0x54   :  { %2092 = shalt.err (!%p2089_p6)
}
  0x55   :  { %s2093_s21 = scalar_lea.vmem %s60_s29, 16  ;;  %s2097_s25 = scalar_lea.vmem %s60_s29, 32 }
  0x56   :  { %p2094_p7 = scmp.ne.s32.totalorder %s60_s29, %s2093_s21  ;;  %p2098_p8 = scmp.lt.s32.totalorder %s60_s29, %s60_s29 }
  0x57   :  { %p2099_p9 = scmp.lt.s32.totalorder %s2097_s25, %s2093_s21 }
  0x59   :  { %p2100_p10 = por %p2099_p9, %p2098_p8 }
  0x5b   :  { %p2101_p11 = pnand %p2100_p10, %p2094_p7 }
  0x5d   :  { %2104 = shalt.err (!%p2101_p11)
}
  0x5e   :  { %62 = dma.hbm_to_vmem [thread:$0]  %s2739_s5, 16, %s60_s29, [#allocation6]  }
  0x5f   :  { %s2105_s1 = scalar_lea.hbm %s2741_s7, 64 }
  0x60   :  { %p2106_p12 = scmp.ne.s32.totalorder %s2741_s7, %s2105_s1  ;;  %p2109_p13 = scmp.lt.u32.totalorder %s2105_s1, %s2741_s7 }
  0x62   :  { %p2111_p0 = pnand %p2109_p13, %p2106_p12 }
  0x64   :  { %2114 = shalt.err (!%p2111_p0)
}
  0x65   :  { %s2115_s18 = scalar_lea.vmem %s80_s6, 64  ;;  %p2120_p2 = scmp.lt.s32.totalorder %s80_s6, %s80_s6 }
  0x66   :  { %p2116_p1 = scmp.ne.s32.totalorder %s80_s6, %s2115_s18  ;;  %p2121_p3 = scmp.lt.s32.totalorder %s2115_s18, %s2115_s18 }
  0x68   :  { %p2122_p4 = por %p2121_p3, %p2120_p2 }
  0x6a   :  { %p2123_p5 = pnand %p2122_p4, %p2116_p1 }
  0x6c   :  { %2126 = shalt.err (!%p2123_p5)
}
  0x6d   :  { %82 = dma.hbm_to_vmem [thread:$0]  %s2741_s7, 64, %s80_s6, [#allocation9]  }
  0x6e   :  { %s2187_s2 = smov [#allocation13]   ;;  %s2188_s20 = smov [#allocation14]  }
  0x6f   :  { %s101_s19 = sshll.u32 %s2187_s2, 4  ;;  %s118_s22 = sshll.u32 %s2188_s20, 4  ;;  %s102_s19 = int_to_ptr.vmem [resolvable:$true] %s101_s19  ;;  %s2372_s22 = int_to_ptr.vmem [resolvable:$true] %s118_s22 }
  0x70   :  { %s2127_s23 = scalar_lea.hbm %s2744_s10, 32 }
  0x71   :  { %p2128_p6 = scmp.ne.s32.totalorder %s2744_s10, %s2127_s23  ;;  %p2131_p7 = scmp.lt.u32.totalorder %s2127_s23, %s2744_s10 }
  0x73   :  { %p2133_p8 = pnand %p2131_p7, %p2128_p6 }
  0x75   :  { %2136 = shalt.err (!%p2133_p8)
}
  0x76   :  { %s2137_s7 = scalar_lea.vmem %s102_s19, 32  ;;  %p2142_p10 = scmp.lt.s32.totalorder %s102_s19, %s102_s19 }
  0x77   :  { %p2138_p9 = scmp.ne.s32.totalorder %s102_s19, %s2137_s7  ;;  %p2143_p11 = scmp.lt.s32.totalorder %s2137_s7, %s2137_s7 }
  0x79   :  { %p2144_p12 = por %p2143_p11, %p2142_p10 }
  0x7b   :  { %p2145_p13 = pnand %p2144_p12, %p2138_p9 }
  0x7d   :  { %2148 = shalt.err (!%p2145_p13)
}
  0x7e   :  { %104 = dma.hbm_to_vmem [thread:$0]  %s2744_s10, 32, %s102_s19, [#allocation12]  }
  0x7f   :  { %s2149_s30 = scalar_lea.hbm %s2749_s15, 2048 }
  0x80   :  { %p2150_p0 = scmp.ne.s32.totalorder %s2749_s15, %s2149_s30  ;;  %p2153_p1 = scmp.lt.u32.totalorder %s2149_s30, %s2749_s15 }
  0x82   :  { %p2155_p2 = pnand %p2153_p1, %p2150_p0 }
  0x84   :  { %2158 = shalt.err (!%p2155_p2)
}
  0x85   :  { %s2159_s20 = scalar_lea.vmem %s2372_s22, 2048  ;;  %p2164_p4 = scmp.lt.s32.totalorder %s2372_s22, %s2372_s22 }
  0x86   :  { %p2160_p3 = scmp.ne.s32.totalorder %s2372_s22, %s2159_s20  ;;  %p2165_p5 = scmp.lt.s32.totalorder %s2159_s20, %s2159_s20 }
  0x88   :  { %p2166_p6 = por %p2165_p5, %p2164_p4 }
  0x8a   :  { %p2167_p7 = pnand %p2166_p6, %p2160_p3 }
  0x8c   :  { %2170 = shalt.err (!%p2167_p7)
}
  0x8d   :  { %s2189_s10 = smov 64   ;;  %s2190_s19 = smov 4  }
  0x8e   :  { %124 = dma.hbm_to_vmem [thread:$0]  %s2749_s15, 2048, %s2372_s22, [#allocation15], %s2189_s10, %s2189_s10, %s2190_s19  }
  0x8f   :  { %2171 = dma.done.wait [#allocation4], 32  }
  0x90   :  { %2172 = vsyncadd [#allocation4], 4294967264 }
  0x91   :  { %2173 = dma.done.wait [#allocation6], 80  }
  0x92   :  { %2174 = vsyncadd [#allocation6], 4294967216 }
  0x93   :  { %2175 = dma.done.wait [#allocation9], 192  }
  0x94   :  { %2176 = vsyncadd [#allocation9], 4294967104 }
  0x95   :  { %2177 = dma.done.wait [#allocation12], 64  }
  0x96   :  { %2178 = vsyncadd [#allocation12], 4294967232 }
  0x97   :  { %2179 = dma.done.wait [#allocation15], 2048  }
  0x98   :  { %2180 = vsyncadd [#allocation15], 4294965248  ;;  %vm166_vm0 = vcmask 1041408   ;;  %v2191_v0 = vmov 0.0   ;;  %vm167_vm1 = vcmask 1042432   ;;  %v2192_v1 = vmov 65535  }
  0x99   :  { %1887 = vmatprep.subr.bf16.mxu1 %v2191_v0  ;;  %v168_v2 = vsel %vm166_vm0, 4294967295, %v2192_v1  ;;  %vm2193_vm2 = vmmov 0   ;;  %v153_v4 = vld [vmem:[#allocation5] sm:$0x7]  ;;  %v152_v5 = vld [vmem:[#allocation3] sm:$0x3] }
  0x9a   :  { %1889 = vmatprep.mubr.msk.bf16.mxu1 %vm2193_vm2, %v2191_v0  ;;  %v169_v3 = vsel %vm167_vm1, %v168_v2, 0  ;;  %vm162_vm3 = vcmask 39936   ;;  %v154_v7 = vpack.c.bf16 %v152_v5, %v152_v5  ;;  %v1802_v8 = vld [vmem:[%s2737_s3] ss:$0 sm:$0xff]  ;;  %vm213_vm4 = vcmask 254976   ;;  %v1959_v21 = vld [vmem:[%s2738_s4 + $0x8] sm:$0xff]  }
  0x9b   :  { %v171_v6 = vand.u32 %v169_v3, %v153_v4  ;;  %v1958_v20 = vld [vmem:[%s2738_s4] sm:$0xff]   ;;  %v1808_v22 = vld.sshfl [vmem:[#allocation10] sm:$0x33 pattern:$0x76325410]  ;;  %v301_v24 = vld [vmem:[#allocation8] sm:$0xff] }
  0x9c   :  { %v313_v23 = vcombine.high %v1808_v22, %v1808_v22  ;;  %vm374_vm5 = vcmask 1043456   ;;  %v1812_v25 = vcombine.high %v301_v24, %v301_v24  ;;  %v1811_v26 = vcombine.low %v301_v24, %v301_v24  ;;  %s2756_s1 = sld [smem:[#allocation21_spill]]  ;;  %v1804_v41 = vld [vmem:[#allocation7] ss:$0 sm:$0xff]  ;;  %v1962_v60 = vld [vmem:[%s2743_s9] sm:$0xff]   ;;  %v1964_v62 = vld [vmem:[%s2743_s9 + $0x10] sm:$0xff]  }
  0x9d   :  { %1888 = vmatpush3.bf16.msra.mxu1 %v171_v6  ;;  %vm256_vm7 = vcmask 261120   ;;  %v319_v37 = vsel %vm166_vm0, %v1808_v22, 0  ;;  %v2194_v40 = vmov 0   ;;  %vm370_vm8 = vcmask 64512   ;;  %v1963_v61 = vld [vmem:[%s2743_s9 + $0x8] sm:$0xff]   ;;  %v1965_v63 = vld [vmem:[%s2743_s9 + $0x18] sm:$0xff]  }
  0x9e   :  { %1893 = vmatprep.subr.bf16.mxu1 %v2191_v0  ;;  %1813 = vmatprep.subr.msk.bf16.mxu0 %vm374_vm5, %v1812_v25  ;;  %v376_v27 = vsel %vm374_vm5, %v1811_v26, 0  ;;  %vm314_vm9 = vcmask 31744   ;;  %vm436_vm10 = vcmask 1045504   ;;  %vm439_vm11 = vcmask 523264   ;;  %s2195_s9 = smov 32   ;;  %s2196_s29 = smov 96  }
  0x9f   :  { %382 = vmatpush1.bf16.msra.mxu0 %v376_v27  ;;  %413 = vmatprep.mubr.bf16.mxu0 %v2194_v40  ;;  %v462_v27 = vlaneseq  ;;  %vm598_vm12 = vcmask 523520   ;;  %s2198_s25 = smov 16   ;;  %s2199_s15 = smov 112   ;;  %vm810_vm13 = vcmask 261248   ;;  %vm899_vm14 = vcmask 130048  }
  0xa0   :  { %1890 = vmatmul.mubr.msk.bf16.vlgmr.msra.gmra.mrb[0].mxu1 %vm162_vm3, %v154_v7  ;;  %1913 = vmatprep.subr.bf16.mxu0 %v2191_v0  ;;  %s2202_s26 = smov 120   ;;  %vm1136_vm15 = vcmask 130112   ;;  %s2206_s7 = smov 88   ;;  %vm1278_vm1 = vcmask 122944   ;;  %vm1290_vm3 = vcmask 254144  }
  0xa1   :  { %1897 = vmatprep.mubr.msk.bf16.mxu1 %vm2193_vm2, %v2191_v0  ;;  %1894 = vmatpush3.bf16.msra.mxu1 %v1958_v20  ;;  %s2207_s6 = smov 40   ;;  %s2208_s28 = smov 72  }
  0xa2   :  { %1895 = vmatprep.subr.bf16.mxu1 %v2191_v0  ;;  %v300_v38 = vld [vmem:[%s2756_s1] sm:$0x3]  ;;  %s2205_s1 = smov 56  }
  0xa3   :  { %v302_v39 = vpack.c.bf16 %v300_v38, %v300_v38 }
  0xa5   :  { %1896 = vmatpush3.bf16.msra.mxu1 %v1959_v21  ;;  %1814 = vmatmul.mubr.msk.bf16.vlgmr.msra.gmra.mrb[0].mxu0 %vm370_vm8, %v302_v39  ;;  %vm1355_vm8 = vcmask 582144  }
  0xa6   :  { %1809 = vmatprep.subr.msk.bf16.mxu1 %vm166_vm0, %v313_v23  ;;  %1917 = vmatprep.mubr.msk.bf16.mxu0 %vm2193_vm2, %v2191_v0 }
 0x173   :  { %v207_v9 = vpop.f32.mrb[0].mxu1 }
 0x174   :  { %v208_v10 = vadd.f32 %v1802_v8, %v207_v9  ;;  %v1891_v11 = vpop.f32.mrb[1].mxu1 }
 0x175   :  { %v210_v12 = vpop.f32.mrb[2].mxu1 }
 0x176   :  { %v1892_v13 = vpop.f32.mrb[3].mxu1  ;;  %v214_v14 = vsel %vm213_vm4, %v208_v10, 0.0 }
 0x177   :  { %215 = vadd.xlane.f32.xlu0 %v214_v14 }
 0x178   :  { %v415_v48 = vpop.f32.mrb[0].mxu0 }
 0x179   :  { %v417_v49 = vpop.f32.mrb[1].mxu0 }
 0x17a   :  { %v419_v50 = vpop.f32.mrb[2].mxu0 }
 0x17b   :  { %v420_v51 = vpop.f32.mrb[3].mxu0 }
 0x204   :  { %v216_v15 = vpop.xlane.xlu0 %215 }
 0x205   :  { %v218_v16 = vmul.f32 0.03125, %v216_v15 }
 0x207   :  { %v219_v17 = vsub.f32 %v208_v10, %v218_v16 }
 0x209   :  { %v220_v18 = vmul.f32 %v219_v17, %v219_v17 }
 0x20b   :  { %v221_v19 = vsel %vm213_vm4, %v220_v18, 0.0  ;;  %vm1310_vm4 = vcmask 319744  }
 0x20c   :  { %222 = vadd.xlane.f32.xlu0 %v221_v19 }
 0x299   :  { %v223_v28 = vpop.xlane.xlu0 %222 }
 0x29a   :  { %v224_v29 = vmul.f32 0.03125, %v223_v28  ;;  %v2458_v28 = vshrl.u32 %v462_v27, 7 }
 0x29c   :  { %v225_v30 = vmax.f32 %v224_v29, 0.0  ;;  %v438_v29 = vld [vmem:[#allocation11] sm:$0x3] }
 0x29e   :  { %v226_v31 = vadd.f32 1e-05, %v225_v30  ;;  %v2461_v30 = vsub.s32 0, %v2458_v28 }
 0x2a0   :  { %1985 = vrsqrt.f32 %v226_v31  ;;  %v2464_v31 = vsub.s32 1, %v2458_v28 }
 0x2aa   :  { %v1986_v32 = vpop.eup %1985 }
 0x2ab   :  { %v228_v33 = vmul.f32 %v1986_v32, %v219_v17 }
 0x2ad   :  { %vm229_vm6 = vcmp.gt.f32.partialorder %v228_v33, 0.0  ;;  %v230_v34 = vmul.f32 0.2, %v228_v33 }
 0x2af   :  { %v231_v35 = vsel %vm229_vm6, %v228_v33, %v230_v34  ;;  %v470_v34 = vrot.slane %v438_v29, %v2464_v31  ;;  %vm1329_vm6 = vcmask 450944  }
 0x2b0   :  { %v236_v36 = vpack.c.bf16 %v231_v35, %v231_v35 }
 0x2b2   :  { %1898 = vmatmul.mubr.msk.bf16.vlgmr.msra.gmra.mrb[4].mxu1 %vm256_vm7, %v236_v36 }
 0x2b3   :  { %325 = vmatpush1.bf16.msra.mxu1 %v319_v37  ;;  %356 = vmatprep.mubr.bf16.mxu1 %v2194_v40 }
 0x2b4   :  { %1901 = vmatprep.subr.bf16.mxu1 %v2191_v0 }
 0x385   :  { %v294_v42 = vpop.f32.mrb[4].mxu1 }
 0x386   :  { %v295_v43 = vadd.f32 %v1804_v41, %v294_v42  ;;  %v1899_v44 = vpop.f32.mrb[5].mxu1 }
 0x387   :  { %v297_v45 = vpop.f32.mrb[6].mxu1 }
 0x388   :  { %v304_v46 = vpack.c.bf16 %v295_v43, %v295_v43  ;;  %v1900_v47 = vpop.f32.mrb[7].mxu1 }
 0x38a   :  { %1810 = vmatmul.mubr.msk.bf16.vlgmr.msra.gmra.mrb[8].mxu1 %vm314_vm9, %v304_v46  ;;  %vm1368_vm9 = vcmask 647744  }
 0x38b   :  { %1909 = vmatprep.mubr.msk.bf16.mxu1 %vm2193_vm2, %v2191_v0  ;;  %1902 = vmatpush3.bf16.msra.mxu1 %v1962_v60  ;;  %vm1284_vm2 = vcmask 188544  }
 0x38c   :  { %1903 = vmatprep.subr.bf16.mxu1 %v2191_v0 }
 0x38f   :  { %1904 = vmatpush3.bf16.msra.mxu1 %v1963_v61 }
 0x390   :  { %1905 = vmatprep.subr.bf16.mxu1 %v2191_v0 }
 0x393   :  { %1906 = vmatpush3.bf16.msra.mxu1 %v1964_v62 }
 0x394   :  { %1907 = vmatprep.subr.bf16.mxu1 %v2191_v0 }
 0x397   :  { %1908 = vmatpush3.bf16.msra.mxu1 %v1965_v63 }
 0x45d   :  { %v358_v52 = vpop.f32.mrb[8].mxu1 }
 0x45e   :  { %v416_v53 = vadd.f32 %v415_v48, %v358_v52  ;;  %v360_v54 = vpop.f32.mrb[9].mxu1 }
 0x45f   :  { %v418_v55 = vadd.f32 %v417_v49, %v360_v54  ;;  %v362_v56 = vpop.f32.mrb[10].mxu1 }
 0x460   :  { %v363_v57 = vpop.f32.mrb[11].mxu1  ;;  %v423_v58 = vrot.slane %v416_v53, 6 }
 0x461   :  { %v430_v59 = vrot.slane %v418_v55, 2  ;;  %v428_v3 = vrot.slane %v418_v55, 4 }
 0x462   :  { %424 = vrot.lane.b32.xlu1 %v423_v58, %s2189_s10 }
 0x466   :  { %431 = vrot.lane.b32.xlu1 %v430_v59, %s2189_s10 }
 0x4d4   :  { %v425_v1 = vpop.permute.xlu1 %424 }
 0x4d5   :  { %v434_v2 = vsel %vm166_vm0, %v416_v53, %v425_v1 }
 0x4d6   :  { %v435_v5 = vsel %vm374_vm5, %v434_v2, %v428_v3 }
 0x4d8   :  { %v432_v4 = vpop.permute.xlu1 %431 }
 0x4d9   :  { %v437_v6 = vsel %vm436_vm10, %v435_v5, %v432_v4 }
 0x4da   :  { %v440_v7 = vsel %vm439_vm11, %v437_v6, 0.0 }
 0x4db   :  { %v441_v8 = vrot.slane %v440_v7, 4 }
 0x4dd   :  { %v442_v9 = vadd.f32 %v441_v8, %v440_v7 }
 0x4df   :  { %v443_v10 = vrot.slane %v442_v9, 2 }
 0x4e1   :  { %v444_v11 = vadd.f32 %v443_v10, %v442_v9 }
 0x4e3   :  { %v445_v12 = vrot.slane %v444_v11, 1 }
 0x4e5   :  { %v446_v13 = vadd.f32 %v445_v12, %v444_v11 }
 0x4e7   :  { %v447_v14 = vmul.f32 0.125, %v446_v13 }
 0x4e9   :  { %v448_v15 = vsub.f32 %v437_v6, %v447_v14 }
 0x4eb   :  { %v449_v16 = vmul.f32 %v448_v15, %v448_v15 }
 0x4ed   :  { %v450_v17 = vsel %vm439_vm11, %v449_v16, 0.0 }
 0x4ee   :  { %v451_v18 = vrot.slane %v450_v17, 4 }
 0x4f0   :  { %v452_v19 = vadd.f32 %v451_v18, %v450_v17 }
 0x4f2   :  { %v453_v20 = vrot.slane %v452_v19, 2 }
 0x4f4   :  { %v454_v21 = vadd.f32 %v453_v20, %v452_v19 }
 0x4f6   :  { %v455_v22 = vrot.slane %v454_v21, 1 }
 0x4f8   :  { %v456_v23 = vadd.f32 %v455_v22, %v454_v21 }
 0x4fa   :  { %v457_v24 = vmul.f32 0.125, %v456_v23 }
 0x4fc   :  { %v458_v25 = vmax.f32 %v457_v24, 0.0 }
 0x4fe   :  { %v459_v26 = vadd.f32 1e-05, %v458_v25 }
 0x500   :  { %1987 = vrsqrt.f32 %v459_v26 }
 0x50a   :  { %v1988_v32 = vpop.eup %1987 }
 0x50b   :  { %v461_v33 = vmul.f32 %v1988_v32, %v438_v29 }
 0x50d   :  { %v465_v35 = vrot.slane %v461_v33, %v2461_v30 }
 0x50f   :  { %v466_v36 = vmul.f32 %v465_v35, %v448_v15 }
 0x511   :  { %v471_v37 = vadd.f32 %v470_v34, %v466_v36  ;;  %v597_v36 = vld [vmem:[#allocation13] sm:$0x3] }
 0x513   :  { %v472_v38 = vmax.f32 %v471_v37, 0.0  ;;  %v644_v37 = vrot.slane %v597_v36, %v2464_v31 }
 0x515   :  { %v473_v39 = vpack.c.bf16 %v472_v38, %v472_v38 }
 0x517   :  { %1910 = vmatmul.mubr.msk.bf16.vlgmr.msra.gmra.mrb[12].mxu1 %vm439_vm11, %v473_v39  ;;  %v1966_v39 = vld [vmem:[%s2745_s11] sm:$0xff]   ;;  %vm1380_vm11 = vcmask 778944  }
 0x518   :  { %1914 = vmatpush3.bf16.msra.mxu0 %v1966_v39 }
 0x519   :  { %1915 = vmatprep.subr.bf16.mxu0 %v2191_v0 }
 0x5ea   :  { %v543_v40 = vpop.f32.mrb[12].mxu1 }
 0x5eb   :  { %v1911_v41 = vpop.f32.mrb[13].mxu1  ;;  %v550_v42 = vrot.slane %v543_v40, 6  ;;  %v555_v43 = vrot.slane %v543_v40, 2 }
 0x5ec   :  { %v546_v44 = vpop.f32.mrb[14].mxu1  ;;  %v1967_v41 = vld [vmem:[%s2745_s11 + $0x8] sm:$0xff]   ;;  %s2197_s11 = smov 80  }
 0x5ed   :  { %551 = vrot.lane.b32.xlu0 %v550_v42, %s2195_s9  ;;  %v1912_v45 = vpop.f32.mrb[15].mxu1  ;;  %v557_v46 = vsel %vm436_vm10, %v555_v43, 0.0  ;;  %1916 = vmatpush3.bf16.msra.mxu0 %v1967_v41 }
 0x5ee   :  { %564 = vrot.lane.b32.xlu1 %v557_v46, %s2189_s10 }
 0x65f   :  { %v552_v47 = vpop.permute.xlu0 %551 }
 0x660   :  { %v554_v48 = vsel %vm166_vm0, 0.0, %v552_v47  ;;  %v565_v49 = vpop.permute.xlu1 %564 }
 0x661   :  { %v567_v50 = vadd.f32 %v565_v49, %v543_v40  ;;  %559 = vrot.lane.b32.xlu1 %v554_v48, %s2195_s9 }
 0x663   :  { %v569_v51 = vrot.slane %v567_v50, 6  ;;  %v582_v52 = vrot.slane %v567_v50, 2  ;;  %v576_v53 = vrot.slane %v567_v50, 4 }
 0x665   :  { %570 = vrot.lane.b32.xlu1 %v569_v51, %s2196_s29 }
 0x669   :  { %583 = vrot.lane.b32.xlu1 %v582_v52, %s2196_s29 }
 0x66d   :  { %577 = vrot.lane.b32.xlu1 %v576_v53, %s2196_s29 }
 0x671   :  { %588 = vrot.lane.b32.xlu1 %v567_v50, %s2196_s29 }
 0x6d3   :  { %v560_v54 = vpop.permute.xlu1 %559 }
 0x6d4   :  { %v562_v56 = vadd.f32 %v560_v54, %v543_v40 }
 0x6d6   :  { %v574_v58 = vrot.slane %v562_v56, 6  ;;  %v580_v60 = vrot.slane %v562_v56, 4  ;;  %v586_v1 = vrot.slane %v562_v56, 2 }
 0x6d7   :  { %v571_v55 = vpop.permute.xlu1 %570 }
 0x6d8   :  { %v591_v59 = vsel %vm166_vm0, %v562_v56, %v571_v55 }
 0x6d9   :  { %v592_v63 = vsel %vm374_vm5, %v591_v59, %v574_v58 }
 0x6db   :  { %v584_v57 = vpop.permute.xlu1 %583 }
 0x6dc   :  { %v594_v62 = vsel %vm166_vm0, %v580_v60, %v584_v57 }
 0x6dd   :  { %v595_v3 = vsel %vm374_vm5, %v594_v62, %v586_v1 }
 0x6df   :  { %v578_v61 = vpop.permute.xlu1 %577 }
 0x6e0   :  { %v593_v2 = vsel %vm436_vm10, %v592_v63, %v578_v61 }
 0x6e1   :  { %v599_v6 = vsel %vm598_vm12, %v593_v2, 0.0 }
 0x6e3   :  { %v589_v4 = vpop.permute.xlu1 %588 }
 0x6e4   :  { %v596_v5 = vsel %vm436_vm10, %v595_v3, %v589_v4 }
 0x6e5   :  { %v600_v7 = vsel %vm598_vm12, %v596_v5, 0.0 }
 0x6e6   :  { %v601_v8 = vadd.f32 %v600_v7, %v599_v6 }
 0x6e8   :  { %v602_v9 = vrot.slane %v601_v8, 4 }
 0x6ea   :  { %v603_v10 = vadd.f32 %v602_v9, %v601_v8 }
 0x6ec   :  { %v604_v11 = vrot.slane %v603_v10, 2 }
 0x6ee   :  { %v605_v12 = vadd.f32 %v604_v11, %v603_v10 }
 0x6f0   :  { %v606_v13 = vrot.slane %v605_v12, 1 }
 0x6f2   :  { %v607_v14 = vadd.f32 %v606_v13, %v605_v12 }
 0x6f4   :  { %v608_v15 = vmul.f32 0.0625, %v607_v14 }
 0x6f6   :  { %v609_v16 = vsub.f32 %v593_v2, %v608_v15  ;;  %v610_v17 = vsub.f32 %v596_v5, %v608_v15 }
 0x6f8   :  { %v611_v18 = vmul.f32 %v609_v16, %v609_v16  ;;  %v612_v19 = vmul.f32 %v610_v17, %v610_v17 }
 0x6fa   :  { %v613_v20 = vsel %vm598_vm12, %v611_v18, 0.0  ;;  %v614_v21 = vsel %vm598_vm12, %v612_v19, 0.0  ;;  %vm1400_vm12 = vcmask 844544  }
 0x6fb   :  { %v615_v22 = vadd.f32 %v614_v21, %v613_v20 }
 0x6fd   :  { %v616_v23 = vrot.slane %v615_v22, 4 }
 0x6ff   :  { %v617_v24 = vadd.f32 %v616_v23, %v615_v22 }
 0x701   :  { %v618_v25 = vrot.slane %v617_v24, 2 }
 0x703   :  { %v619_v26 = vadd.f32 %v618_v25, %v617_v24 }
 0x705   :  { %v620_v27 = vrot.slane %v619_v26, 1 }
 0x707   :  { %v621_v29 = vadd.f32 %v620_v27, %v619_v26 }
 0x709   :  { %v622_v32 = vmul.f32 0.0625, %v621_v29 }
 0x70b   :  { %v623_v33 = vmax.f32 %v622_v32, 0.0 }
 0x70d   :  { %v624_v34 = vadd.f32 1e-05, %v623_v33 }
 0x70f   :  { %1989 = vrsqrt.f32 %v624_v34 }
 0x719   :  { %v1990_v35 = vpop.eup %1989 }
 0x71a   :  { %627 = vrot.lane.b32.xlu0 %v1990_v35, %s2196_s29 }
 0x71e   :  { %646 = vrot.lane.b32.xlu0 %v644_v37, %s2195_s9 }
 0x78c   :  { %v628_v38 = vpop.permute.xlu0 %627 }
 0x78d   :  { %v630_v40 = vmul.f32 %v628_v38, %v597_v36 }
 0x78f   :  { %v634_v42 = vrot.slane %v630_v40, %v2461_v30 }
 0x790   :  { %v647_v44 = vpop.permute.xlu0 %646 }
 0x791   :  { %636 = vrot.lane.b32.xlu1 %v634_v42, %s2195_s9 }
 0x803   :  { %v637_v43 = vpop.permute.xlu1 %636 }
 0x804   :  { %v639_v45 = vmul.f32 %v637_v43, %v609_v16  ;;  %v640_v46 = vmul.f32 %v637_v43, %v610_v17 }
 0x806   :  { %v649_v47 = vadd.f32 %v647_v44, %v639_v45  ;;  %v650_v48 = vadd.f32 %v647_v44, %v640_v46 }
 0x808   :  { %v651_v49 = vmax.f32 %v649_v47, 0.0  ;;  %v652_v50 = vmax.f32 %v650_v48, 0.0 }
 0x80a   :  { %v653_v51 = vpack.c.bf16 %v652_v50, %v651_v49 }
 0x80c   :  { %659 = vrot.lane.b32.xlu1 %v653_v51, %s2196_s29 }
 0x87e   :  { %v660_v52 = vpop.permute.xlu1 %659 }
 0x87f   :  { %1918 = vmatmul.mubr.msk.bf16.vlgmr.msra.gmra.mrb[4].mxu0 %vm256_vm7, %v660_v52  ;;  %vm1335_vm7 = vcmask 516544  }
 0x952   :  { %v710_v53 = vpop.f32.mrb[4].mxu0 }
 0x953   :  { %v1919_v54 = vpop.f32.mrb[5].mxu0  ;;  %v719_v0 = vrot.slane %v710_v53, 6  ;;  %v728_v56 = vrot.slane %v710_v53, 2 }
 0x954   :  { %v713_v55 = vpop.f32.mrb[6].mxu0 }
 0x955   :  { %v720_v57 = vrot.slane %v713_v55, 6  ;;  %v729_v58 = vrot.slane %v713_v55, 2  ;;  %722 = vrot.lane.b32.xlu0 %v719_v0, %s2197_s11  ;;  %v1920_v59 = vpop.f32.mrb[7].mxu0 }
 0x957   :  { %v730_v60 = vsel %vm436_vm10, %v728_v56, %v729_v58  ;;  %v732_v61 = vsel %vm436_vm10, %v729_v58, 0.0  ;;  %v721_v62 = vsel %vm166_vm0, %v719_v0, %v720_v57 }
 0x958   :  { %743 = vrot.lane.b32.xlu1 %v730_v60, %s2195_s9 }
 0x959   :  { %745 = vrot.lane.b32.xlu0 %v732_v61, %s2195_s9 }
 0x95c   :  { %724 = vrot.lane.b32.xlu1 %v721_v62, %s2197_s11 }
 0x9c7   :  { %v723_v63 = vpop.permute.xlu0 %722 }
 0x9c8   :  { %v727_v1 = vsel %vm166_vm0, 0.0, %v723_v63 }
 0x9c9   :  { %734 = vrot.lane.b32.xlu0 %v727_v1, %s2198_s25 }
 0x9ca   :  { %v744_v2 = vpop.permute.xlu1 %743 }
 0x9cb   :  { %v749_v3 = vadd.f32 %v744_v2, %v710_v53  ;;  %v746_v5 = vpop.permute.xlu0 %745 }
 0x9cc   :  { %v750_v7 = vadd.f32 %v746_v5, %v713_v55 }
 0x9cd   :  { %v752_v4 = vrot.slane %v749_v3, 6  ;;  %v759_v8 = vrot.slane %v749_v3, 4  ;;  %v765_v10 = vrot.slane %v749_v3, 2 }
 0x9ce   :  { %v725_v6 = vpop.permute.xlu1 %724  ;;  %v775_v9 = vrot.slane %v750_v7, 6  ;;  %v788_v11 = vrot.slane %v750_v7, 2  ;;  %v782_v12 = vrot.slane %v750_v7, 4 }
 0x9cf   :  { %753 = vrot.lane.b32.xlu0 %v752_v4, %s2199_s15  ;;  %736 = vrot.lane.b32.xlu1 %v725_v6, %s2198_s25 }
 0x9d3   :  { %760 = vrot.lane.b32.xlu0 %v759_v8, %s2199_s15  ;;  %771 = vrot.lane.b32.xlu1 %v749_v3, %s2199_s15 }
 0x9d7   :  { %776 = vrot.lane.b32.xlu0 %v775_v9, %s2199_s15  ;;  %766 = vrot.lane.b32.xlu1 %v765_v10, %s2199_s15 }
 0x9db   :  { %789 = vrot.lane.b32.xlu0 %v788_v11, %s2199_s15  ;;  %783 = vrot.lane.b32.xlu1 %v782_v12, %s2199_s15 }
 0x9df   :  { %794 = vrot.lane.b32.xlu1 %v750_v7, %s2199_s15 }
 0xa3b   :  { %v735_v13 = vpop.permute.xlu0 %734 }
 0xa3c   :  { %v740_v16 = vadd.f32 %v735_v13, %v710_v53 }
 0xa3e   :  { %v757_v21 = vrot.slane %v740_v16, 6  ;;  %v763_v22 = vrot.slane %v740_v16, 4  ;;  %v769_v25 = vrot.slane %v740_v16, 2 }
 0xa41   :  { %v754_v14 = vpop.permute.xlu0 %753  ;;  %v737_v15 = vpop.permute.xlu1 %736 }
 0xa42   :  { %v797_v19 = vsel %vm166_vm0, %v740_v16, %v754_v14  ;;  %v741_v20 = vadd.f32 %v737_v15, %v713_v55 }
 0xa43   :  { %v798_v23 = vsel %vm374_vm5, %v797_v19, %v757_v21  ;;  %v809_v21 = vld [vmem:[%s2746_s12] sm:$0x3]  ;;  %s2200_s12 = smov 104  }
 0xa44   :  { %v780_v34 = vrot.slane %v741_v20, 6  ;;  %v786_v36 = vrot.slane %v741_v20, 4  ;;  %v792_v46 = vrot.slane %v741_v20, 2 }
 0xa45   :  { %v761_v17 = vpop.permute.xlu0 %760  ;;  %v772_v18 = vpop.permute.xlu1 %771 }
 0xa46   :  { %v799_v27 = vsel %vm436_vm10, %v798_v23, %v761_v17 }
 0xa47   :  { %v811_v37 = vsel %vm810_vm13, %v799_v27, 0.0 }
 0xa49   :  { %v777_v24 = vpop.permute.xlu0 %776  ;;  %v767_v26 = vpop.permute.xlu1 %766 }
 0xa4a   :  { %v803_v29 = vsel %vm166_vm0, %v741_v20, %v777_v24  ;;  %v800_v32 = vsel %vm166_vm0, %v763_v22, %v767_v26  ;;  %v870_v22 = vrot.slane %v809_v21, %v2464_v31  ;;  %v1968_v24 = vld [vmem:[%s2747_s13] sm:$0xff]   ;;  %s2201_s13 = smov 8  }
 0xa4b   :  { %v801_v33 = vsel %vm374_vm5, %v800_v32, %v769_v25  ;;  %v804_v39 = vsel %vm374_vm5, %v803_v29, %v780_v34  ;;  %1921 = vmatprep.subr.bf16.mxu1 %v1968_v24 }
 0xa4c   :  { %v802_v35 = vsel %vm436_vm10, %v801_v33, %v772_v18  ;;  %1922 = vmatpush3.bf16.msra.mxu1 %v1968_v24 }
 0xa4d   :  { %v790_v38 = vpop.permute.xlu0 %789  ;;  %v812_v40 = vsel %vm810_vm13, %v802_v35, 0.0  ;;  %v784_v41 = vpop.permute.xlu1 %783 }
 0xa4e   :  { %v806_v42 = vsel %vm166_vm0, %v786_v36, %v790_v38  ;;  %v813_v43 = vadd.f32 %v812_v40, %v811_v37  ;;  %v805_v44 = vsel %vm436_vm10, %v804_v39, %v784_v41 }
 0xa4f   :  { %v814_v45 = vsel %vm810_vm13, %v805_v44, 0.0  ;;  %v807_v48 = vsel %vm374_vm5, %v806_v42, %v792_v46 }
 0xa50   :  { %v815_v47 = vadd.f32 %v814_v45, %v813_v43 }
 0xa51   :  { %v795_v49 = vpop.permute.xlu1 %794 }
 0xa52   :  { %v808_v50 = vsel %vm436_vm10, %v807_v48, %v795_v49 }
 0xa53   :  { %v816_v51 = vsel %vm810_vm13, %v808_v50, 0.0 }
 0xa54   :  { %v817_v52 = vadd.f32 %v816_v51, %v815_v47 }
 0xa56   :  { %v818_v53 = vrot.slane %v817_v52, 4 }
 0xa58   :  { %v819_v54 = vadd.f32 %v818_v53, %v817_v52 }
 0xa5a   :  { %v820_v0 = vrot.slane %v819_v54, 2 }
 0xa5c   :  { %v821_v55 = vadd.f32 %v820_v0, %v819_v54 }
 0xa5e   :  { %v822_v56 = vrot.slane %v821_v55, 1 }
 0xa60   :  { %v823_v57 = vadd.f32 %v822_v56, %v821_v55 }
 0xa62   :  { %v824_v58 = vmul.f32 0.03125, %v823_v57 }
 0xa64   :  { %v825_v59 = vsub.f32 %v799_v27, %v824_v58  ;;  %v826_v60 = vsub.f32 %v802_v35, %v824_v58  ;;  %v827_v61 = vsub.f32 %v805_v44, %v824_v58  ;;  %v828_v62 = vsub.f32 %v808_v50, %v824_v58 }
 0xa66   :  { %v829_v63 = vmul.f32 %v825_v59, %v825_v59  ;;  %v830_v1 = vmul.f32 %v826_v60, %v826_v60  ;;  %v831_v2 = vmul.f32 %v827_v61, %v827_v61  ;;  %v832_v3 = vmul.f32 %v828_v62, %v828_v62 }
 0xa68   :  { %v833_v4 = vsel %vm810_vm13, %v829_v63, 0.0  ;;  %v834_v5 = vsel %vm810_vm13, %v830_v1, 0.0  ;;  %v836_v7 = vsel %vm810_vm13, %v831_v2, 0.0  ;;  %v838_v9 = vsel %vm810_vm13, %v832_v3, 0.0 }
 0xa69   :  { %v835_v6 = vadd.f32 %v834_v5, %v833_v4  ;;  %vm1413_vm13 = vcmask 910144  }
 0xa6b   :  { %v837_v8 = vadd.f32 %v836_v7, %v835_v6 }
 0xa6d   :  { %v839_v10 = vadd.f32 %v838_v9, %v837_v8 }
 0xa6f   :  { %v840_v11 = vrot.slane %v839_v10, 4 }
 0xa71   :  { %v841_v12 = vadd.f32 %v840_v11, %v839_v10 }
 0xa73   :  { %v842_v13 = vrot.slane %v841_v12, 2 }
 0xa75   :  { %v843_v14 = vadd.f32 %v842_v13, %v841_v12 }
 0xa77   :  { %v844_v15 = vrot.slane %v843_v14, 1 }
 0xa79   :  { %v845_v16 = vadd.f32 %v844_v15, %v843_v14 }
 0xa7b   :  { %v846_v17 = vmul.f32 0.03125, %v845_v16 }
 0xa7d   :  { %v847_v18 = vmax.f32 %v846_v17, 0.0 }
 0xa7f   :  { %v848_v19 = vadd.f32 1e-05, %v847_v18 }
 0xa81   :  { %1991 = vrsqrt.f32 %v848_v19 }
 0xa8b   :  { %v1992_v20 = vpop.eup %1991 }
 0xa8c   :  { %851 = vrot.lane.b32.xlu0 %v1992_v20, %s2199_s15 }
 0xa90   :  { %872 = vrot.lane.b32.xlu0 %v870_v22, %s2198_s25 }
 0xafe   :  { %v852_v23 = vpop.permute.xlu0 %851 }
 0xaff   :  { %v854_v25 = vmul.f32 %v852_v23, %v809_v21 }
 0xb01   :  { %v858_v26 = vrot.slane %v854_v25, %v2461_v30 }
 0xb02   :  { %v873_v29 = vpop.permute.xlu0 %872 }
 0xb03   :  { %860 = vrot.lane.b32.xlu1 %v858_v26, %s2198_s25 }
 0xb75   :  { %v861_v27 = vpop.permute.xlu1 %860 }
 0xb76   :  { %v863_v32 = vmul.f32 %v861_v27, %v825_v59  ;;  %v864_v33 = vmul.f32 %v861_v27, %v826_v60  ;;  %v865_v34 = vmul.f32 %v861_v27, %v827_v61  ;;  %v866_v35 = vmul.f32 %v861_v27, %v828_v62 }
 0xb78   :  { %v875_v36 = vadd.f32 %v873_v29, %v863_v32  ;;  %v876_v37 = vadd.f32 %v873_v29, %v864_v33  ;;  %v877_v38 = vadd.f32 %v873_v29, %v865_v34  ;;  %v878_v39 = vadd.f32 %v873_v29, %v866_v35 }
 0xb7a   :  { %v881_v40 = vmax.f32 %v877_v38, 0.0  ;;  %v882_v41 = vmax.f32 %v878_v39, 0.0  ;;  %v879_v42 = vmax.f32 %v875_v36, 0.0  ;;  %v880_v43 = vmax.f32 %v876_v37, 0.0 }
 0xb7c   :  { %v884_v44 = vpack.c.bf16 %v882_v41, %v881_v40  ;;  %v883_v45 = vpack.c.bf16 %v880_v43, %v879_v42 }
 0xb7e   :  { %891 = vrot.lane.b32.xlu0 %v884_v44, %s2199_s15  ;;  %889 = vrot.lane.b32.xlu1 %v883_v45, %s2199_s15 }
 0xbf0   :  { %v892_v46 = vpop.permute.xlu0 %891  ;;  %v890_v47 = vpop.permute.xlu1 %889 }
 0xbf1   :  { %1923 = vmatprep.mubr.msk.bf16.mxu1 %vm899_vm14, %v890_v47 }
 0xbf2   :  { %1924 = vmatmul.mubr.msk.bf16.vlgmr.msra.gmra.mrb[16].mxu1 %vm899_vm14, %v892_v46  ;;  %vm1419_vm14 = vcmask 975744  }
 0xcc5   :  { %v2553_v48 = vpop.f32.mrb[16].mxu1 }
 0xcc6   :  { %v2555_v49 = vpop.f32.mrb[17].mxu1  ;;  %v962_v52 = vrot.slane %v2553_v48, 6  ;;  %v979_v53 = vrot.slane %v2553_v48, 2 }
 0xcc7   :  { %v2557_v50 = vpop.f32.mrb[18].mxu1  ;;  %v959_v51 = vrot.slane %v2555_v49, 6  ;;  %v976_v56 = vrot.slane %v2555_v49, 2 }
 0xcc8   :  { %v964_v54 = vrot.slane %v2557_v50, 6  ;;  %v981_v0 = vrot.slane %v2557_v50, 2  ;;  %v2564_v55 = vpop.f32.mrb[19].mxu1 }
 0xcc9   :  { %v960_v57 = vrot.slane %v2564_v55, 6  ;;  %v977_v58 = vrot.slane %v2564_v55, 2  ;;  %966 = vrot.lane.b32.xlu1 %v959_v51, %s2200_s12 }
 0xcca   :  { %v982_v59 = vsel %vm436_vm10, %v979_v53, %v981_v0  ;;  %v965_v60 = vsel %vm166_vm0, %v962_v52, %v964_v54  ;;  %v984_v2 = vsel %vm436_vm10, %v981_v0, 0.0 }
 0xccb   :  { %v978_v61 = vsel %vm436_vm10, %v976_v56, %v977_v58  ;;  %v980_v62 = vsel %vm436_vm10, %v977_v58, %v979_v53  ;;  %v961_v63 = vsel %vm166_vm0, %v959_v51, %v960_v57  ;;  %v963_v1 = vsel %vm166_vm0, %v960_v57, %v962_v52 }
 0xccc   :  { %1003 = vrot.lane.b32.xlu0 %v978_v61, %s2198_s25 }
 0xccd   :  { %1005 = vrot.lane.b32.xlu1 %v980_v62, %s2198_s25 }
 0xcd0   :  { %968 = vrot.lane.b32.xlu0 %v961_v63, %s2200_s12 }
 0xcd1   :  { %1007 = vrot.lane.b32.xlu1 %v982_v59, %s2198_s25 }
 0xcd4   :  { %970 = vrot.lane.b32.xlu0 %v963_v1, %s2200_s12 }
 0xcd5   :  { %1009 = vrot.lane.b32.xlu1 %v984_v2, %s2198_s25 }
 0xcd8   :  { %972 = vrot.lane.b32.xlu0 %v965_v60, %s2200_s12 }
 0xd3b   :  { %v967_v3 = vpop.permute.xlu1 %966 }
 0xd3c   :  { %v975_v4 = vsel %vm166_vm0, 0.0, %v967_v3 }
 0xd3d   :  { %986 = vrot.lane.b32.xlu1 %v975_v4, %s2201_s13 }
 0xd3e   :  { %v1004_v5 = vpop.permute.xlu0 %1003 }
 0xd3f   :  { %v1006_v6 = vpop.permute.xlu1 %1005  ;;  %v1015_v10 = vadd.f32 %v1004_v5, %v2555_v49 }
 0xd40   :  { %v1016_v13 = vadd.f32 %v1006_v6, %v2564_v55 }
 0xd41   :  { %v1033_v17 = vrot.slane %v1015_v10, 2  ;;  %v1020_v18 = vrot.slane %v1015_v10, 6  ;;  %v1027_v20 = vrot.slane %v1015_v10, 4 }
 0xd42   :  { %v969_v7 = vpop.permute.xlu0 %968  ;;  %v1056_v19 = vrot.slane %v1016_v13, 2  ;;  %v1043_v23 = vrot.slane %v1016_v13, 6  ;;  %v1050_v25 = vrot.slane %v1016_v13, 4 }
 0xd43   :  { %988 = vrot.lane.b32.xlu0 %v969_v7, %s2201_s13  ;;  %v1008_v8 = vpop.permute.xlu1 %1007 }
 0xd44   :  { %v1017_v11 = vadd.f32 %v2553_v48, %v1008_v8 }
 0xd46   :  { %v971_v9 = vpop.permute.xlu0 %970  ;;  %v1078_v14 = vrot.slane %v1017_v11, 6  ;;  %v1085_v15 = vrot.slane %v1017_v11, 4  ;;  %v1091_v16 = vrot.slane %v1017_v11, 2 }
 0xd47   :  { %990 = vrot.lane.b32.xlu0 %v971_v9, %s2201_s13  ;;  %v1010_v21 = vpop.permute.xlu1 %1009 }
 0xd48   :  { %v1018_v22 = vadd.f32 %v2557_v50, %v1010_v21 }
 0xd4a   :  { %v973_v12 = vpop.permute.xlu0 %972  ;;  %v1108_v24 = vrot.slane %v1018_v22, 4  ;;  %v1101_v26 = vrot.slane %v1018_v22, 6  ;;  %v1114_v27 = vrot.slane %v1018_v22, 2 }
 0xd4b   :  { %1039 = vrot.lane.b32.xlu0 %v1015_v10, %s2202_s26  ;;  %992 = vrot.lane.b32.xlu1 %v973_v12, %s2201_s13 }
 0xd4f   :  { %1079 = vrot.lane.b32.xlu0 %v1078_v14, %s2202_s26  ;;  %1062 = vrot.lane.b32.xlu1 %v1016_v13, %s2202_s26 }
 0xd53   :  { %1086 = vrot.lane.b32.xlu0 %v1085_v15, %s2202_s26  ;;  %1092 = vrot.lane.b32.xlu1 %v1091_v16, %s2202_s26 }
 0xd57   :  { %1034 = vrot.lane.b32.xlu0 %v1033_v17, %s2202_s26  ;;  %1021 = vrot.lane.b32.xlu1 %v1020_v18, %s2202_s26 }
 0xd5b   :  { %1057 = vrot.lane.b32.xlu0 %v1056_v19, %s2202_s26  ;;  %1028 = vrot.lane.b32.xlu1 %v1027_v20, %s2202_s26 }
 0xd5f   :  { %1097 = vrot.lane.b32.xlu0 %v1017_v11, %s2202_s26  ;;  %1044 = vrot.lane.b32.xlu1 %v1043_v23, %s2202_s26 }
 0xd63   :  { %1109 = vrot.lane.b32.xlu0 %v1108_v24, %s2202_s26  ;;  %1051 = vrot.lane.b32.xlu1 %v1050_v25, %s2202_s26 }
 0xd67   :  { %1120 = vrot.lane.b32.xlu0 %v1018_v22, %s2202_s26  ;;  %1102 = vrot.lane.b32.xlu1 %v1101_v26, %s2202_s26 }
 0xd6b   :  { %1115 = vrot.lane.b32.xlu1 %v1114_v27, %s2202_s26 }
 0xdaf   :  { %v987_v32 = vpop.permute.xlu1 %986 }
 0xdb0   :  { %v998_v40 = vadd.f32 %v987_v32, %v2555_v49 }
 0xdb2   :  { %v1031_v44 = vrot.slane %v998_v40, 4  ;;  %v1037_v47 = vrot.slane %v998_v40, 2  ;;  %v1025_v52 = vrot.slane %v998_v40, 6 }
 0xdb5   :  { %v989_v29 = vpop.permute.xlu0 %988 }
 0xdb6   :  { %v999_v43 = vadd.f32 %v989_v29, %v2564_v55 }
 0xdb8   :  { %v1054_v54 = vrot.slane %v999_v43, 4  ;;  %v1060_v58 = vrot.slane %v999_v43, 2  ;;  %v1048_v2 = vrot.slane %v999_v43, 6 }
 0xdb9   :  { %v991_v33 = vpop.permute.xlu0 %990 }
 0xdba   :  { %v1000_v49 = vadd.f32 %v2553_v48, %v991_v33 }
 0xdbc   :  { %v1089_v48 = vrot.slane %v1000_v49, 4  ;;  %v1083_v5 = vrot.slane %v1000_v49, 6  ;;  %v1095_v14 = vrot.slane %v1000_v49, 2 }
 0xdbd   :  { %v1040_v34 = vpop.permute.xlu0 %1039  ;;  %v993_v35 = vpop.permute.xlu1 %992 }
 0xdbe   :  { %v1001_v4 = vadd.f32 %v2557_v50, %v993_v35 }
 0xdc0   :  { %v1106_v20 = vrot.slane %v1001_v4, 6  ;;  %v1112_v32 = vrot.slane %v1001_v4, 4 }
 0xdc1   :  { %v1080_v36 = vpop.permute.xlu0 %1079  ;;  %v1063_v37 = vpop.permute.xlu1 %1062 }
 0xdc2   :  { %v1123_v3 = vsel %vm166_vm0, %v1000_v49, %v1080_v36 }
 0xdc3   :  { %v1124_v13 = vsel %vm374_vm5, %v1123_v3, %v1083_v5 }
 0xdc5   :  { %v1087_v38 = vpop.permute.xlu0 %1086  ;;  %v1093_v39 = vpop.permute.xlu1 %1092 }
 0xdc6   :  { %v1126_v9 = vsel %vm166_vm0, %v1089_v48, %v1093_v39  ;;  %v1125_v50 = vsel %vm436_vm10, %v1124_v13, %v1087_v38 }
 0xdc7   :  { %v1127_v17 = vsel %vm374_vm5, %v1126_v9, %v1095_v14  ;;  %v1144_v25 = vsel %vm1136_vm15, %v1125_v50, 0.0 }
 0xdc9   :  { %v1035_v41 = vpop.permute.xlu0 %1034  ;;  %v1022_v42 = vpop.permute.xlu1 %1021 }
 0xdca   :  { %v1068_v45 = vsel %vm166_vm0, %v1031_v44, %v1035_v41  ;;  %v1065_v46 = vsel %vm166_vm0, %v998_v40, %v1022_v42 }
 0xdcb   :  { %v1069_v0 = vsel %vm374_vm5, %v1068_v45, %v1037_v47  ;;  %v1066_v56 = vsel %vm374_vm5, %v1065_v46, %v1025_v52 }
 0xdcc   :  { %v1070_v60 = vsel %vm436_vm10, %v1069_v0, %v1040_v34  ;;  %v1118_v34 = vrot.slane %v1001_v4, 2 }
 0xdcd   :  { %v1058_v51 = vpop.permute.xlu0 %1057  ;;  %v1029_v53 = vpop.permute.xlu1 %1028  ;;  %v1138_v6 = vsel %vm1136_vm15, %v1070_v60, 0.0 }
 0xdce   :  { %v1074_v57 = vsel %vm166_vm0, %v1054_v54, %v1058_v51  ;;  %v1067_v55 = vsel %vm436_vm10, %v1066_v56, %v1029_v53 }
 0xdcf   :  { %v1075_v62 = vsel %vm374_vm5, %v1074_v57, %v1060_v58  ;;  %v1137_v63 = vsel %vm1136_vm15, %v1067_v55, 0.0 }
 0xdd0   :  { %v1076_v10 = vsel %vm436_vm10, %v1075_v62, %v1063_v37  ;;  %v1139_v11 = vadd.f32 %v1138_v6, %v1137_v63 }
 0xdd1   :  { %v1045_v59 = vpop.permute.xlu1 %1044  ;;  %v1098_v1 = vpop.permute.xlu0 %1097  ;;  %v1142_v19 = vsel %vm1136_vm15, %v1076_v10, 0.0 }
 0xdd2   :  { %v1071_v61 = vsel %vm166_vm0, %v999_v43, %v1045_v59  ;;  %v1128_v22 = vsel %vm436_vm10, %v1127_v17, %v1098_v1 }
 0xdd3   :  { %v1072_v7 = vsel %vm374_vm5, %v1071_v61, %v1048_v2  ;;  %v1146_v33 = vsel %vm1136_vm15, %v1128_v22, 0.0 }
 0xdd5   :  { %v1052_v8 = vpop.permute.xlu1 %1051  ;;  %v1110_v18 = vpop.permute.xlu0 %1109 }
 0xdd6   :  { %v1073_v12 = vsel %vm436_vm10, %v1072_v7, %v1052_v8 }
 0xdd7   :  { %v1140_v15 = vsel %vm1136_vm15, %v1073_v12, 0.0 }
 0xdd8   :  { %v1141_v16 = vadd.f32 %v1140_v15, %v1139_v11 }
 0xdd9   :  { %v1103_v21 = vpop.permute.xlu1 %1102  ;;  %v1121_v38 = vpop.permute.xlu0 %1120 }
 0xdda   :  { %v1143_v23 = vadd.f32 %v1142_v19, %v1141_v16  ;;  %v1129_v24 = vsel %vm166_vm0, %v1001_v4, %v1103_v21 }
 0xddb   :  { %v1130_v26 = vsel %vm374_vm5, %v1129_v24, %v1106_v20 }
 0xddc   :  { %v1145_v27 = vadd.f32 %v1144_v25, %v1143_v23  ;;  %v1131_v29 = vsel %vm436_vm10, %v1130_v26, %v1110_v18 }
 0xddd   :  { %v1116_v35 = vpop.permute.xlu1 %1115  ;;  %v1148_v39 = vsel %vm1136_vm15, %v1131_v29, 0.0 }
 0xdde   :  { %v1147_v36 = vadd.f32 %v1146_v33, %v1145_v27  ;;  %v1132_v37 = vsel %vm166_vm0, %v1112_v32, %v1116_v35  ;;  %v1135_v32 = vld [vmem:[%s2748_s14] sm:$0x3]  ;;  %s2204_s14 = smov 24   ;;  %vm1267_vm0 = vcmask 57344  }
 0xddf   :  { %v1133_v40 = vsel %vm374_vm5, %v1132_v37, %v1118_v34  ;;  %v1224_v33 = vrot.slane %v1135_v32, %v2464_v31  ;;  %v2203_v37 = vmov 1966171168   ;;  %vm1323_vm5 = vcmask 385344  }
 0xde0   :  { %v1149_v41 = vadd.f32 %v1148_v39, %v1147_v36  ;;  %v1134_v42 = vsel %vm436_vm10, %v1133_v40, %v1121_v38  ;;  %v1251_v38 = vunpack.c.l.s4 %v2203_v37  ;;  %v1969_v37 = vld [vmem:[#allocation14 + $0x40] sm:$0xff]   ;;  %vm1374_vm10 = vcmask 713344  }
 0xde1   :  { %v1150_v43 = vsel %vm1136_vm15, %v1134_v42, 0.0  ;;  %1865 = vmatprep.subr.bf16.mxu0 %v1969_v37 }
 0xde2   :  { %v1151_v44 = vadd.f32 %v1150_v43, %v1149_v41  ;;  %v1252_v39 = vunpack.c.0.s8 %v1251_v38  ;;  %v1970_v38 = vld [vmem:[#allocation14] sm:$0xff]  }
 0xde3   :  { %1866 = vmatpush3.bf16.msra.mxu0 %v1970_v38 }
 0xde4   :  { %v1152_v45 = vrot.slane %v1151_v44, 4  ;;  %v2662_v40 = vsub.s32 %v1252_v39, %v2458_v28 }
 0xde6   :  { %v1153_v46 = vadd.f32 %v1152_v45, %v1151_v44 }
 0xde8   :  { %v1154_v47 = vrot.slane %v1153_v46, 2 }
 0xdea   :  { %v1155_v51 = vadd.f32 %v1154_v47, %v1153_v46 }
 0xdec   :  { %v1156_v52 = vrot.slane %v1155_v51, 1 }
 0xdee   :  { %v1157_v53 = vadd.f32 %v1156_v52, %v1155_v51 }
 0xdf0   :  { %v1158_v54 = vmul.f32 0.015625, %v1157_v53 }
 0xdf2   :  { %v1159_v0 = vsub.f32 %v1067_v55, %v1158_v54  ;;  %v1160_v56 = vsub.f32 %v1070_v60, %v1158_v54  ;;  %v1161_v49 = vsub.f32 %v1073_v12, %v1158_v54  ;;  %v1162_v57 = vsub.f32 %v1076_v10, %v1158_v54 }
 0xdf3   :  { %v1163_v58 = vsub.f32 %v1125_v50, %v1158_v54  ;;  %v1164_v59 = vsub.f32 %v1128_v22, %v1158_v54  ;;  %v1165_v61 = vsub.f32 %v1131_v29, %v1158_v54  ;;  %v1166_v62 = vsub.f32 %v1134_v42, %v1158_v54 }
 0xdf4   :  { %v1167_v63 = vmul.f32 %v1159_v0, %v1159_v0  ;;  %v1168_v1 = vmul.f32 %v1160_v56, %v1160_v56  ;;  %v1169_v2 = vmul.f32 %v1161_v49, %v1161_v49  ;;  %v1170_v3 = vmul.f32 %v1162_v57, %v1162_v57 }
 0xdf5   :  { %v1171_v6 = vmul.f32 %v1163_v58, %v1163_v58  ;;  %v1172_v60 = vmul.f32 %v1164_v59, %v1164_v59  ;;  %v1173_v10 = vmul.f32 %v1165_v61, %v1165_v61  ;;  %v1174_v13 = vmul.f32 %v1166_v62, %v1166_v62 }
 0xdf6   :  { %v1175_v48 = vsel %vm1136_vm15, %v1167_v63, 0.0  ;;  %v1176_v4 = vsel %vm1136_vm15, %v1168_v1, 0.0  ;;  %v1178_v7 = vsel %vm1136_vm15, %v1169_v2, 0.0  ;;  %v1180_v8 = vsel %vm1136_vm15, %v1170_v3, 0.0 }
 0xdf7   :  { %v1177_v5 = vadd.f32 %v1176_v4, %v1175_v48  ;;  %v1182_v11 = vsel %vm1136_vm15, %v1171_v6, 0.0  ;;  %v1184_v14 = vsel %vm1136_vm15, %v1172_v60, 0.0  ;;  %v1186_v50 = vsel %vm1136_vm15, %v1173_v10, 0.0 }
 0xdf8   :  { %v1188_v17 = vsel %vm1136_vm15, %v1174_v13, 0.0  ;;  %vm1425_vm15 = vcmask 1041344  }
 0xdf9   :  { %v1179_v55 = vadd.f32 %v1178_v7, %v1177_v5 }
 0xdfb   :  { %v1181_v9 = vadd.f32 %v1180_v8, %v1179_v55 }
 0xdfd   :  { %v1183_v12 = vadd.f32 %v1182_v11, %v1181_v9 }
 0xdff   :  { %v1185_v15 = vadd.f32 %v1184_v14, %v1183_v12 }
 0xe01   :  { %v1187_v16 = vadd.f32 %v1186_v50, %v1185_v15 }
 0xe03   :  { %v1189_v18 = vadd.f32 %v1188_v17, %v1187_v16 }
 0xe05   :  { %v1190_v19 = vrot.slane %v1189_v18, 4 }
 0xe07   :  { %v1191_v20 = vadd.f32 %v1190_v19, %v1189_v18 }
 0xe09   :  { %v1192_v21 = vrot.slane %v1191_v20, 2 }
 0xe0b   :  { %v1193_v22 = vadd.f32 %v1192_v21, %v1191_v20 }
 0xe0d   :  { %v1194_v23 = vrot.slane %v1193_v22, 1 }
 0xe0f   :  { %v1195_v24 = vadd.f32 %v1194_v23, %v1193_v22 }
 0xe11   :  { %v1196_v25 = vmul.f32 0.015625, %v1195_v24 }
 0xe13   :  { %v1197_v26 = vmax.f32 %v1196_v25, 0.0 }
 0xe15   :  { %v1198_v27 = vadd.f32 1e-05, %v1197_v26 }
 0xe17   :  { %1993 = vrsqrt.f32 %v1198_v27 }
 0xe21   :  { %v1994_v29 = vpop.eup %1993 }
 0xe22   :  { %1201 = vrot.lane.b32.xlu1 %v1994_v29, %s2202_s26 }
 0xe26   :  { %1226 = vrot.lane.b32.xlu1 %v1224_v33, %s2201_s13 }
 0xe94   :  { %v1202_v34 = vpop.permute.xlu1 %1201 }
 0xe95   :  { %v1204_v35 = vmul.f32 %v1202_v34, %v1135_v32 }
 0xe97   :  { %v1208_v36 = vrot.slane %v1204_v35, %v2461_v30 }
 0xe98   :  { %v1227_v42 = vpop.permute.xlu1 %1226 }
 0xe99   :  { %1210 = vrot.lane.b32.xlu0 %v1208_v36, %s2201_s13 }
 0xf0b   :  { %v1211_v41 = vpop.permute.xlu0 %1210 }
 0xf0c   :  { %v1217_v43 = vmul.f32 %v1211_v41, %v1163_v58  ;;  %v1218_v44 = vmul.f32 %v1211_v41, %v1164_v59  ;;  %v1213_v45 = vmul.f32 %v1211_v41, %v1159_v0  ;;  %v1214_v31 = vmul.f32 %v1211_v41, %v1160_v56 }
 0xf0d   :  { %v1219_v46 = vmul.f32 %v1211_v41, %v1165_v61  ;;  %v1220_v47 = vmul.f32 %v1211_v41, %v1166_v62  ;;  %v1215_v51 = vmul.f32 %v1211_v41, %v1161_v49  ;;  %v1216_v52 = vmul.f32 %v1211_v41, %v1162_v57 }
 0xf0e   :  { %v1233_v53 = vadd.f32 %v1227_v42, %v1217_v43  ;;  %v1234_v30 = vadd.f32 %v1227_v42, %v1218_v44  ;;  %v1229_v54 = vadd.f32 %v1227_v42, %v1213_v45  ;;  %v1230_v63 = vadd.f32 %v1227_v42, %v1214_v31  ;;  %v1972_v43 = vld [vmem:[#allocation14 + $0x8] sm:$0xff]  }
 0xf0f   :  { %v1235_v1 = vadd.f32 %v1227_v42, %v1219_v46  ;;  %v1236_v2 = vadd.f32 %v1227_v42, %v1220_v47  ;;  %v1231_v3 = vadd.f32 %v1227_v42, %v1215_v51  ;;  %v1232_v48 = vadd.f32 %v1227_v42, %v1216_v52  ;;  %v1971_v42 = vld [vmem:[#allocation14 + $0x48] sm:$0xff]   ;;  %v1973_v47 = vld [vmem:[#allocation14 + $0x50] sm:$0xff]  }
 0xf10   :  { %v1241_v28 = vmax.f32 %v1233_v53, 0.0  ;;  %v1242_v4 = vmax.f32 %v1234_v30, 0.0  ;;  %v1237_v5 = vmax.f32 %v1229_v54, 0.0  ;;  %v1238_v6 = vmax.f32 %v1230_v63, 0.0  ;;  %1867 = vmatprep.subr.bf16.mxu0 %v1971_v42  ;;  %v1974_v51 = vld [vmem:[#allocation14 + $0x10] sm:$0xff]   ;;  %v1975_v63 = vld [vmem:[#allocation14 + $0x58] sm:$0xff]  }
 0xf11   :  { %v1243_v58 = vmax.f32 %v1235_v1, 0.0  ;;  %v1244_v59 = vmax.f32 %v1236_v2, 0.0  ;;  %v1239_v0 = vmax.f32 %v1231_v3, 0.0  ;;  %v1240_v56 = vmax.f32 %v1232_v48, 0.0  ;;  %1868 = vmatpush3.bf16.msra.mxu0 %v1972_v43  ;;  %v1976_v1 = vld [vmem:[#allocation14 + $0x18] sm:$0xff]  }
 0xf12   :  { %v1247_v61 = vpack.c.bf16 %v1242_v4, %v1241_v28  ;;  %v1245_v62 = vpack.c.bf16 %v1238_v6, %v1237_v5  ;;  %v1828_v49 = vpack.c.bf16 %v1242_v4, %v1242_v4  ;;  %v1826_v57 = vpack.c.bf16 %v1238_v6, %v1238_v6  ;;  %1869 = vmatprep.subr.bf16.mxu0 %v1973_v47  ;;  %v1977_v4 = vld [vmem:[#allocation14 + $0x60] sm:$0xff]  }
 0xf13   :  { %v1248_v60 = vpack.c.bf16 %v1244_v59, %v1243_v58  ;;  %v1246_v8 = vpack.c.bf16 %v1240_v56, %v1239_v0  ;;  %v1829_v13 = vpack.c.bf16 %v1244_v59, %v1244_v59  ;;  %v1827_v14 = vpack.c.bf16 %v1240_v56, %v1240_v56  ;;  %v1978_v5 = vld [vmem:[#allocation14 + $0x20] sm:$0xff]   ;;  %v1979_v59 = vld [vmem:[#allocation14 + $0x68] sm:$0xff]   ;;  %v1981_v56 = vld [vmem:[#allocation14 + $0x70] sm:$0xff]  }
 0xf14   :  { %v2665_v7 = vrot.slane %v1247_v61, %v2662_v40  ;;  %v2668_v55 = vrot.slane %v1245_v62, %v2662_v40  ;;  %v1473_v11 = vrot.slane %v1828_v49, %v2662_v40  ;;  %v1299_v12 = vrot.slane %v1826_v57, %v2662_v40  ;;  %v1980_v0 = vld [vmem:[#allocation14 + $0x28] sm:$0xff]   ;;  %v1982_v49 = vld [vmem:[#allocation14 + $0x30] sm:$0xff]   ;;  %v1983_v57 = vld [vmem:[#allocation14 + $0x78] sm:$0xff]  }
 0xf15   :  { %v1514_v16 = vrot.slane %v1248_v60, %v2662_v40  ;;  %v1344_v17 = vrot.slane %v1246_v8, %v2662_v40  ;;  %v1555_v20 = vrot.slane %v1829_v13, %v2662_v40  ;;  %v1389_v21 = vrot.slane %v1827_v14, %v2662_v40  ;;  %1870 = vmatpush3.bf16.msra.mxu0 %v1974_v51  ;;  %v1984_v60 = vld [vmem:[#allocation14 + $0x38] sm:$0xff]   ;;  %v1830_v47 = vld [vmem:[%s2750_s16] ss:$0 sm:$0xff] }
 0xf16   :  { %v1441_v9 = vrot.slane %v2665_v7, %v2662_v40  ;;  %v1263_v10 = vrot.slane %v2668_v55, %v2662_v40  ;;  %v1480_v15 = vrot.slane %v1473_v11, %v2662_v40  ;;  %v1306_v50 = vrot.slane %v1299_v12, %v2662_v40  ;;  %1871 = vmatprep.subr.bf16.mxu0 %v1975_v63 }
 0xf17   :  { %v1521_v18 = vrot.slane %v1514_v16, %v2662_v40  ;;  %v1351_v19 = vrot.slane %v1344_v17, %v2662_v40  ;;  %v1562_v22 = vrot.slane %v1555_v20, %v2662_v40  ;;  %v1396_v23 = vrot.slane %v1389_v21, %v2662_v40 }
 0xf18   :  { %1442 = vrot.lane.b32.xlu1 %v1441_v9, %s2202_s26  ;;  %1264 = vrot.lane.b32.xlu0 %v1263_v10, %s2202_s26  ;;  %v1456_v24 = vcombine.high %v1441_v9, %v1441_v9  ;;  %v1280_v25 = vcombine.high %v1263_v10, %v1263_v10  ;;  %v1485_v26 = vcombine.high %v1473_v11, %v1473_v11 }
 0xf19   :  { %v1312_v27 = vcombine.high %v1299_v12, %v1299_v12  ;;  %v1497_v33 = vcombine.high %v1480_v15, %v1480_v15  ;;  %v1325_v34 = vcombine.high %v1306_v50, %v1306_v50  ;;  %v1526_v35 = vcombine.high %v1514_v16, %v1514_v16  ;;  %1872 = vmatpush3.bf16.msra.mxu0 %v1976_v1 }
 0xf1a   :  { %v2691_v29 = vrot.slane %v1485_v26, %v2662_v40  ;;  %v1357_v36 = vcombine.high %v1344_v17, %v1344_v17  ;;  %v1538_v44 = vcombine.high %v1521_v18, %v1521_v18  ;;  %v1370_v45 = vcombine.high %v1351_v19, %v1351_v19  ;;  %1873 = vmatprep.subr.bf16.mxu0 %v1977_v4 }
 0xf1b   :  { %v2694_v32 = vrot.slane %v1312_v27, %v2662_v40  ;;  %v1533_v39 = vrot.slane %v1526_v35, %v2662_v40  ;;  %v1567_v31 = vcombine.high %v1555_v20, %v1555_v20  ;;  %v1402_v46 = vcombine.high %v1389_v21, %v1389_v21 }
 0xf1c   :  { %1481 = vrot.lane.b32.xlu1 %v1480_v15, %s2204_s14  ;;  %1307 = vrot.lane.b32.xlu0 %v1306_v50, %s2204_s14  ;;  %v1364_v41 = vrot.slane %v1357_v36, %v2662_v40  ;;  %v1446_v30 = vcombine.high %v2665_v7, %v2665_v7  ;;  %v1269_v54 = vcombine.high %v2668_v55, %v2668_v55 }
 0xf1d   :  { %v1574_v52 = vrot.slane %v1567_v31, %v2662_v40  ;;  %v1409_v53 = vrot.slane %v1402_v46, %v2662_v40  ;;  %v1579_v2 = vcombine.high %v1562_v22, %v1562_v22  ;;  %v1415_v3 = vcombine.high %v1396_v23, %v1396_v23  ;;  %1874 = vmatpush3.bf16.msra.mxu0 %v1978_v5 }
 0xf1e   :  { %v1453_v48 = vrot.slane %v1446_v30, %v2662_v40  ;;  %v1276_v28 = vrot.slane %v1269_v54, %v2662_v40  ;;  %1875 = vmatprep.subr.bf16.mxu0 %v1979_v59  ;;  %v1502_v61 = vcombine.high %v2691_v29, %v2691_v29  ;;  %v1331_v62 = vcombine.high %v2694_v32, %v2694_v32 }
 0xf1f   :  { %v1543_v7 = vcombine.high %v1533_v39, %v1533_v39  ;;  %v1376_v55 = vcombine.high %v1364_v41, %v1364_v41  ;;  %v1584_v8 = vcombine.high %v1574_v52, %v1574_v52  ;;  %v1421_v9 = vcombine.high %v1409_v53, %v1409_v53 }
 0xf20   :  { %1522 = vrot.lane.b32.xlu1 %v1521_v18, %s2205_s1  ;;  %1352 = vrot.lane.b32.xlu0 %v1351_v19, %s2205_s1  ;;  %v1461_v6 = vcombine.high %v1453_v48, %v1453_v48  ;;  %v1286_v58 = vcombine.high %v1276_v28, %v1276_v28 }
 0xf21   :  { %1876 = vmatpush3.bf16.msra.mxu0 %v1980_v0 }
 0xf22   :  { %1877 = vmatprep.subr.bf16.mxu0 %v1981_v56 }
 0xf24   :  { %1563 = vrot.lane.b32.xlu1 %v1562_v22, %s2206_s7  ;;  %1397 = vrot.lane.b32.xlu0 %v1396_v23, %s2206_s7 }
 0xf25   :  { %1878 = vmatpush3.bf16.msra.mxu0 %v1982_v49 }
 0xf26   :  { %1879 = vmatprep.subr.bf16.mxu0 %v1983_v57 }
 0xf28   :  { %1457 = vrot.lane.b32.xlu1 %v1456_v24, %s2201_s13  ;;  %1281 = vrot.lane.b32.xlu0 %v1280_v25, %s2201_s13 }
 0xf29   :  { %1880 = vmatpush3.bf16.msra.mxu0 %v1984_v60 }
 0xf2c   :  { %1493 = vrot.lane.b32.xlu1 %v2691_v29, %s2195_s9  ;;  %1320 = vrot.lane.b32.xlu0 %v2694_v32, %s2195_s9 }
 0xf30   :  { %1498 = vrot.lane.b32.xlu1 %v1497_v33, %s2207_s6  ;;  %1326 = vrot.lane.b32.xlu0 %v1325_v34, %s2207_s6 }
 0xf34   :  { %1534 = vrot.lane.b32.xlu1 %v1533_v39, %s2189_s10  ;;  %1365 = vrot.lane.b32.xlu0 %v1364_v41, %s2189_s10  ;;  %s2209_s10 = smov 48  }
 0xf38   :  { %1539 = vrot.lane.b32.xlu1 %v1538_v44, %s2208_s28  ;;  %1371 = vrot.lane.b32.xlu0 %v1370_v45, %s2208_s28 }
 0xf3c   :  { %1575 = vrot.lane.b32.xlu1 %v1574_v52, %s2196_s29  ;;  %1410 = vrot.lane.b32.xlu0 %v1409_v53, %s2196_s29 }
 0xf40   :  { %1580 = vrot.lane.b32.xlu1 %v1579_v2, %s2200_s12  ;;  %1416 = vrot.lane.b32.xlu0 %v1415_v3, %s2200_s12 }
 0xf44   :  { %1462 = vrot.lane.b32.xlu1 %v1461_v6, %s2198_s25  ;;  %1287 = vrot.lane.b32.xlu0 %v1286_v58, %s2198_s25 }
 0xf48   :  { %1503 = vrot.lane.b32.xlu1 %v1502_v61, %s2209_s10  ;;  %1332 = vrot.lane.b32.xlu0 %v1331_v62, %s2209_s10 }
 0xf4c   :  { %1544 = vrot.lane.b32.xlu1 %v1543_v7, %s2197_s11  ;;  %1377 = vrot.lane.b32.xlu0 %v1376_v55, %s2197_s11 }
 0xf50   :  { %1585 = vrot.lane.b32.xlu1 %v1584_v8, %s2199_s15  ;;  %1422 = vrot.lane.b32.xlu0 %v1421_v9, %s2199_s15 }
 0xf8a   :  { %v1443_v10 = vpop.permute.xlu1 %1442  ;;  %v1265_v11 = vpop.permute.xlu0 %1264 }
 0xf8b   :  { %1445 = vst.msk [vmem:[#allocation2 + $0x1] sm:$0x1] %vm1267_vm0, %v1443_v10  ;;  %1268 = vst.msk [vmem:[#allocation2] sm:$0x1] %vm1267_vm0, %v1265_v11 }
 0xf8c   :  { %1455 = vst.msk [vmem:[#allocation2 + $0x1] sm:$0x1] %vm1278_vm1, %v1453_v48  ;;  %1279 = vst.msk [vmem:[#allocation2] sm:$0x1] %vm1278_vm1, %v1276_v28 }
 0xf8e   :  { %v1482_v12 = vpop.permute.xlu1 %1481  ;;  %v1308_v13 = vpop.permute.xlu0 %1307 }
 0xf92   :  { %v1523_v14 = vpop.permute.xlu1 %1522  ;;  %v1353_v15 = vpop.permute.xlu0 %1352 }
 0xf96   :  { %v1564_v50 = vpop.permute.xlu1 %1563  ;;  %v1398_v16 = vpop.permute.xlu0 %1397 }
 0xf9a   :  { %v1458_v17 = vpop.permute.xlu1 %1457  ;;  %v1282_v18 = vpop.permute.xlu0 %1281 }
 0xf9b   :  { %1460 = vst.msk [vmem:[#allocation2 + $0x1] sm:$0x1] %vm1284_vm2, %v1458_v17  ;;  %1285 = vst.msk [vmem:[#allocation2] sm:$0x1] %vm1284_vm2, %v1282_v18 }
 0xf9e   :  { %v1494_v19 = vpop.permute.xlu1 %1493  ;;  %v1321_v20 = vpop.permute.xlu0 %1320 }
 0xfa2   :  { %v1499_v21 = vpop.permute.xlu1 %1498  ;;  %v1327_v22 = vpop.permute.xlu0 %1326 }
 0xfa6   :  { %v1535_v23 = vpop.permute.xlu1 %1534  ;;  %v1366_v24 = vpop.permute.xlu0 %1365 }
 0xfaa   :  { %v1540_v25 = vpop.permute.xlu1 %1539  ;;  %v1372_v26 = vpop.permute.xlu0 %1371 }
 0xfae   :  { %v1576_v27 = vpop.permute.xlu1 %1575  ;;  %v1411_v29 = vpop.permute.xlu0 %1410 }
 0xfb2   :  { %v1581_v32 = vpop.permute.xlu1 %1580  ;;  %v1417_v33 = vpop.permute.xlu0 %1416 }
 0xfb6   :  { %v1463_v34 = vpop.permute.xlu1 %1462  ;;  %v1288_v35 = vpop.permute.xlu0 %1287 }
 0xfb7   :  { %1465 = vst.msk [vmem:[#allocation2 + $0x1] sm:$0x1] %vm1290_vm3, %v1463_v34  ;;  %1291 = vst.msk [vmem:[#allocation2] sm:$0x1] %vm1290_vm3, %v1288_v35 }
 0xfb8   :  { %1484 = vst.msk [vmem:[#allocation2 + $0x1] sm:$0x1] %vm1310_vm4, %v1482_v12  ;;  %1311 = vst.msk [vmem:[#allocation2] sm:$0x1] %vm1310_vm4, %v1308_v13 }
 0xfb9   :  { %1496 = vst.msk [vmem:[#allocation2 + $0x1] sm:$0x1] %vm1323_vm5, %v1494_v19  ;;  %1324 = vst.msk [vmem:[#allocation2] sm:$0x1] %vm1323_vm5, %v1321_v20 }
 0xfba   :  { %1501 = vst.msk [vmem:[#allocation2 + $0x1] sm:$0x1] %vm1329_vm6, %v1499_v21  ;;  %v1504_v36 = vpop.permute.xlu1 %1503  ;;  %1330 = vst.msk [vmem:[#allocation2] sm:$0x1] %vm1329_vm6, %v1327_v22  ;;  %v1333_v37 = vpop.permute.xlu0 %1332 }
 0xfbb   :  { %1506 = vst.msk [vmem:[#allocation2 + $0x1] sm:$0x1] %vm1335_vm7, %v1504_v36  ;;  %1336 = vst.msk [vmem:[#allocation2] sm:$0x1] %vm1335_vm7, %v1333_v37 }
 0xfbc   :  { %1525 = vst.msk [vmem:[#allocation2 + $0x1] sm:$0x1] %vm1355_vm8, %v1523_v14  ;;  %1356 = vst.msk [vmem:[#allocation2] sm:$0x1] %vm1355_vm8, %v1353_v15 }
 0xfbd   :  { %1537 = vst.msk [vmem:[#allocation2 + $0x1] sm:$0x1] %vm1368_vm9, %v1535_v23  ;;  %1369 = vst.msk [vmem:[#allocation2] sm:$0x1] %vm1368_vm9, %v1366_v24 }
 0xfbe   :  { %1542 = vst.msk [vmem:[#allocation2 + $0x1] sm:$0x1] %vm1374_vm10, %v1540_v25  ;;  %v1545_v38 = vpop.permute.xlu1 %1544  ;;  %1375 = vst.msk [vmem:[#allocation2] sm:$0x1] %vm1374_vm10, %v1372_v26  ;;  %v1378_v39 = vpop.permute.xlu0 %1377 }
 0xfbf   :  { %1547 = vst.msk [vmem:[#allocation2 + $0x1] sm:$0x1] %vm1380_vm11, %v1545_v38  ;;  %1381 = vst.msk [vmem:[#allocation2] sm:$0x1] %vm1380_vm11, %v1378_v39 }
 0xfc0   :  { %1566 = vst.msk [vmem:[#allocation2 + $0x1] sm:$0x1] %vm1400_vm12, %v1564_v50  ;;  %1401 = vst.msk [vmem:[#allocation2] sm:$0x1] %vm1400_vm12, %v1398_v16 }
 0xfc1   :  { %1578 = vst.msk [vmem:[#allocation2 + $0x1] sm:$0x1] %vm1413_vm13, %v1576_v27  ;;  %1414 = vst.msk [vmem:[#allocation2] sm:$0x1] %vm1413_vm13, %v1411_v29 }
 0xfc2   :  { %1583 = vst.msk [vmem:[#allocation2 + $0x1] sm:$0x1] %vm1419_vm14, %v1581_v32  ;;  %v1586_v41 = vpop.permute.xlu1 %1585  ;;  %1420 = vst.msk [vmem:[#allocation2] sm:$0x1] %vm1419_vm14, %v1417_v33  ;;  %v1423_v42 = vpop.permute.xlu0 %1422 }
 0xfc3   :  { %1588 = vst.msk [vmem:[#allocation2 + $0x1] sm:$0x1] %vm1425_vm15, %v1586_v41  ;;  %1426 = vst.msk [vmem:[#allocation2] sm:$0x1] %vm1425_vm15, %v1423_v42 }
 0xfca   :  { %v1831_v43 = vld.sshfl [vmem:[#allocation2] sm:$0x11 pattern:$0x75316420] }
 0xfcb   :  { %v1637_v44 = vcombine.high %v1831_v43, %v1831_v43  ;;  %v1644_v31 = vrot.slane %v1831_v43, %v2662_v40 }
 0xfcd   :  { %v1651_v45 = vrot.slane %v1637_v44, %v2662_v40 }
 0xfcf   :  { %1782 = vmatprep.mubr.bf16.mxu0 %v1651_v45 }
 0xfd0   :  { %1783 = vmatmul.mubr.bf16.vlgmr.msra.gmra.mrb[8].mxu0 %v1644_v31 }
0x10a3   :  { %v1881_v46 = vpop.f32.mrb[8].mxu0 }
0x10a4   :  { %v1882_v51 = vpop.f32.mrb[9].mxu0 }
0x10a5   :  { %v1883_v52 = vadd.f32 %v1882_v51, %v1881_v46  ;;  %v1884_v53 = vpop.f32.mrb[10].mxu0 }
0x10a6   :  { %v1885_v30 = vpop.f32.mrb[11].mxu0 }
0x10a7   :  { %v1785_v54 = vadd.f32 %v1883_v52, %v1830_v47 }
0x10a9   :  { %v1848_v63 = vclamps-f32 %v1785_v54, 1.0 }
0x10ab   :  { %1792 = vst [vmem:[%s2751_s17] sm:$0x3] %v1848_v63 }
0x10ac   :  { %1797 = vsyncpa [#allocation4], 1 }
0x10ad   :  { %1798 = vsyncpa [#allocation6], 1 }
0x10ae   :  { %1799 = vsyncpa [#allocation9], 1 }
0x10af   :  { %1800 = vsyncpa [#allocation12], 1 }
0x10b0   :  { %1801 = vsyncpa [#allocation15], 1 }

</bundles_post_ra>
